<compile_context>
chip_gen: v7x
topology: tpu7x:2x2x1
jax: 0.10.0
libtpu: 0.0.40
codegen_flags: <defaults>
</compile_context>

<pallas_src>
import functools

import jax
import jax.numpy as jnp
from jax import lax
from jax.experimental import pallas as pl
from jax.experimental.pallas import tpu as pltpu

LANE = 128
SUBLANE = 8
GROUP = 8          # bags pooled per inner iteration -> one dense (8, D) scratch store


def _round_up(x, m):
    return (x + m - 1) // m * m


def _embedbag_fc_kernel(tokens_ref,   # SMEM (padded_batch*seq,) int32 (scalar prefetch)
                        emb_ref,      # VMEM (vocab, D) f32
                        w_ref,        # VMEM (D, n_pad) f32   (already scaled by 1/seq)
                        b_ref,        # VMEM (1, n_pad) f32
                        out_ref,      # VMEM (tb, n_pad) f32  -- this row tile
                        pooled_ref,   # VMEM scratch (tb//GROUP, GROUP, D) f32
                        *, seq_len, tb):
    t = pl.program_id(0)
    row0 = t * tb
    embed_dim = emb_ref.shape[1]
    n_groups = tb // GROUP

    def pool_group(g):
        # Pool GROUP consecutive bags; token ids are pre-clamped in the wrapper.
        rows = []
        for r in range(GROUP):                       # static unroll
            base = (row0 + g * GROUP + r) * seq_len
            acc = emb_ref[pl.ds(tokens_ref[base], 1), :]          # (1, D) gather
            for s in range(1, seq_len):                           # static unroll
                acc = acc + emb_ref[pl.ds(tokens_ref[base + s], 1), :]
            rows.append(acc)                                       # stays in vregs
        # One dense (GROUP, D) store; leading-dim index may be dynamic.
        pooled_ref[g] = jnp.concatenate(rows, axis=0)

    if n_groups <= 2:
        for g in range(n_groups):                    # tiny tile: fully unrolled
            pool_group(g)
    else:
        def body(g, carry):
            pool_group(g)
            return carry
        lax.fori_loop(0, n_groups, body, 0)

    # One MXU matmul per row tile; 1/seq_len already folded into w_ref.
    pooled = pooled_ref[...].reshape(tb, embed_dim)
    out_ref[...] = (
        jnp.dot(pooled, w_ref[...], preferred_element_type=jnp.float32) + b_ref[...]
    )


def text_classification_forward(token_index, emb_table, fc_w, fc_b, *, tb_max=128):
    """token_index: (B, S) int -> logits (B, num_class) f32.

    emb_table: (vocab, embed_dim)      == nn.EmbeddingBag.weight
    fc_w:      (embed_dim, num_class)  == nn.Linear.weight.T
    fc_b:      (num_class,)
    """
    batch, seq_len = token_index.shape
    vocab, embed_dim = emb_table.shape
    num_class = fc_w.shape[1]

    # Tile / padding choices: batch padded to the row tile, num_class padded to a full
    # 128-lane vector so every kernel store is dense. Wrapper slices both back.
    padded_batch = _round_up(batch, SUBLANE)
    tb = _round_up(min(tb_max, padded_batch), SUBLANE)
    padded_batch = _round_up(padded_batch, tb)
    n_pad = _round_up(num_class, LANE)

    # Vectorized OOB guard once in the wrapper (VMEM refs have no runtime bound check).
    # NOTE: PyTorch would raise on out-of-range ids; here they are clamped to [0, vocab).
    tokens = jnp.clip(token_index.astype(jnp.int32), 0, vocab - 1)
    if padded_batch != batch:
        tokens = jnp.pad(tokens, ((0, padded_batch - batch), (0, 0)))  # pad bags use id 0
    tokens_flat = tokens.reshape(-1)   # 1-D SMEM scalar prefetch (no 128-col padding)

    # Fold the mean's 1/seq_len into the FC weight (last-ulp-level change only).
    inv_seq = jnp.float32(1.0 / seq_len)
    w_pad = jnp.zeros((embed_dim, n_pad), jnp.float32).at[:, :num_class].set(
        fc_w.astype(jnp.float32) * inv_seq)
    b_pad = jnp.zeros((1, n_pad), jnp.float32).at[0, :num_class].set(
        fc_b.astype(jnp.float32).reshape(-1))

    # Derived VMEM budget: double-buffered resident inputs + out tile + scratch + slack.
    lane_d = _round_up(embed_dim, LANE)
    table_buf = _round_up(vocab, SUBLANE) * lane_d * 4
    w_buf = _round_up(embed_dim, SUBLANE) * n_pad * 4
    b_buf = SUBLANE * n_pad * 4
    out_buf = tb * n_pad * 4
    pooled_buf = tb * lane_d * 4
    vmem_bytes = 2 * (table_buf + w_buf + b_buf + out_buf) + pooled_buf + (2 << 20)
    vmem_bytes = min(vmem_bytes, 100 * 1024 * 1024)

    kernel = functools.partial(_embedbag_fc_kernel, seq_len=seq_len, tb=tb)

    grid_spec = pltpu.PrefetchScalarGridSpec(
        num_scalar_prefetch=1,                 # flattened token ids land in SMEM
        grid=(padded_batch // tb,),
        in_specs=[
            pl.BlockSpec((vocab, embed_dim), lambda t, tok: (0, 0)),   # full emb table
            pl.BlockSpec((embed_dim, n_pad), lambda t, tok: (0, 0)),   # fc weight (scaled)
            pl.BlockSpec((1, n_pad), lambda t, tok: (0, 0)),           # fc bias
        ],
        out_specs=pl.BlockSpec((tb, n_pad), lambda t, tok: (t, 0)),
        scratch_shapes=[pltpu.VMEM((tb // GROUP, GROUP, embed_dim), jnp.float32)],
    )

    out_padded = pl.pallas_call(
        kernel,
        out_shape=jax.ShapeDtypeStruct((padded_batch, n_pad), jnp.float32),
        grid_spec=grid_spec,
        compiler_params=pltpu.CompilerParams(
            dimension_semantics=("parallel",),     # independent bags
            vmem_limit_bytes=vmem_bytes,
        ),
    )(tokens_flat, emb_table.astype(jnp.float32), w_pad, b_pad)

    return out_padded[:batch, :num_class]


def _reference_forward(token_index, emb_table, fc_w, fc_b):
    gathered = emb_table[token_index]            # (B, S, D)
    pooled = gathered.mean(axis=1)               # (B, D)  EmbeddingBag mode="mean"
    return pooled @ fc_w + fc_b


if __name__ == "__main__":
    # Shapes consistent with the module defaults (vocab=15000, embed_dim=64, num_class=2).
    VOCAB_SIZE = 15000
    EMBED_DIM = 64
    NUM_CLASS = 2
    BATCH = 22       # not a multiple of 8 -> exercises batch padding; 3 groups -> fori path
    SEQ = 16

    key = jax.random.PRNGKey(0)
    k_emb, k_w, k_b, k_tok = jax.random.split(key, 4)

    # nn.EmbeddingBag weight ~ N(0, 1); nn.Linear ~ U(-1/sqrt(fan_in), 1/sqrt(fan_in))
    emb_table = jax.random.normal(k_emb, (VOCAB_SIZE, EMBED_DIM), dtype=jnp.float32)
    bound = 1.0 / (EMBED_DIM ** 0.5)
    fc_w = jax.random.uniform(k_w, (EMBED_DIM, NUM_CLASS), jnp.float32, -bound, bound)
    fc_b = jax.random.uniform(k_b, (NUM_CLASS,), jnp.float32, -bound, bound)

    token_index = jax.random.randint(k_tok, (BATCH, SEQ), 0, VOCAB_SIZE, dtype=jnp.int32)

    ref = _reference_forward(token_index, emb_table, fc_w, fc_b)

    # Default tile: single grid step, fori_loop pooling path.
    out = jax.block_until_ready(
        text_classification_forward(token_index, emb_table, fc_w, fc_b))
    assert out.shape == (BATCH, NUM_CLASS)
    assert jnp.allclose(out, ref, atol=1e-4, rtol=1e-4), (out, ref)

    # Small tile: multiple grid steps, Python-unrolled pooling path.
    out_small = jax.block_until_ready(
        text_classification_forward(token_index, emb_table, fc_w, fc_b, tb_max=8))
    assert jnp.allclose(out_small, ref, atol=1e-4, rtol=1e-4), (out_small, ref)

    print("KERNEL_OK")
</pallas_src>

<mosaic_0001>
module attributes {stable_mosaic.version = 11 : i64} {
  func.func @_embedbag_fc_kernel(%arg0: i32, %arg1: memref<384xi32, #tpu.memory_space<smem>>, %arg2: memref<15000x64xf32, #tpu.memory_space<vmem>>, %arg3: memref<64x128xf32, #tpu.memory_space<vmem>>, %arg4: memref<1x128xf32, #tpu.memory_space<vmem>>, %arg5: memref<24x128xf32, #tpu.memory_space<vmem>>, %arg6: memref<3x8x64xf32, #tpu.memory_space<vmem>>) attributes {dimension_semantics = [#tpu.dimension_semantics<parallel>], iteration_bounds = array<i64: 1>, scalar_prefetch = 1 : i64, scratch_operands = 1 : i64, tpu.core_type = #tpu.core_type<tc>, window_params = [{pipeline_mode = #tpu.pipeline_mode<synchronous>, transform_indices = @transform_0, window_bounds = array<i64: 15000, 64>}, {pipeline_mode = #tpu.pipeline_mode<synchronous>, transform_indices = @transform_1, window_bounds = array<i64: 64, 128>}, {pipeline_mode = #tpu.pipeline_mode<synchronous>, transform_indices = @transform_2, window_bounds = array<i64: 1, 128>}, {transform_indices = @transform_3, window_bounds = array<i64: 24, 128>}]} {
    %c24_i32 = arith.constant 24 : i32
    %0 = arith.muli %arg0, %c24_i32 : i32
    %c0_i32 = arith.constant 0 : i32
    %c3_i32 = arith.constant 3 : i32
    %1 = arith.addi %c0_i32, %c3_i32 : i32
    %c1_i32 = arith.constant 1 : i32
    scf.for %arg7 = %c0_i32 to %1 step %c1_i32  : i32 {
      %c8_i32 = arith.constant 8 : i32
      %10 = arith.muli %arg7, %c8_i32 : i32
      %11 = arith.addi %0, %10 : i32
      %c0_i32_9 = arith.constant 0 : i32
      %12 = arith.addi %11, %c0_i32_9 : i32
      %c16_i32 = arith.constant 16 : i32
      %13 = arith.muli %12, %c16_i32 : i32
      %14 = arith.index_cast %13 : i32 to index
      %15 = memref.load %arg1[%14] : memref<384xi32, #tpu.memory_space<smem>>
      %16 = arith.index_cast %15 : i32 to index
      %c0_10 = arith.constant 0 : index
      %17 = vector.load %arg2[%16, %c0_10] : memref<15000x64xf32, #tpu.memory_space<vmem>>, vector<1x64xf32>
      %c1_i32_11 = arith.constant 1 : i32
      %18 = arith.addi %13, %c1_i32_11 : i32
      %19 = arith.index_cast %18 : i32 to index
      %20 = memref.load %arg1[%19] : memref<384xi32, #tpu.memory_space<smem>>
      %21 = arith.index_cast %20 : i32 to index
      %c0_12 = arith.constant 0 : index
      %22 = vector.load %arg2[%21, %c0_12] : memref<15000x64xf32, #tpu.memory_space<vmem>>, vector<1x64xf32>
      %23 = arith.addf %17, %22 : vector<1x64xf32>
      %c2_i32 = arith.constant 2 : i32
      %24 = arith.addi %13, %c2_i32 : i32
      %25 = arith.index_cast %24 : i32 to index
      %26 = memref.load %arg1[%25] : memref<384xi32, #tpu.memory_space<smem>>
      %27 = arith.index_cast %26 : i32 to index
      %c0_13 = arith.constant 0 : index
      %28 = vector.load %arg2[%27, %c0_13] : memref<15000x64xf32, #tpu.memory_space<vmem>>, vector<1x64xf32>
      %29 = arith.addf %23, %28 : vector<1x64xf32>
      %c3_i32_14 = arith.constant 3 : i32
      %30 = arith.addi %13, %c3_i32_14 : i32
      %31 = arith.index_cast %30 : i32 to index
      %32 = memref.load %arg1[%31] : memref<384xi32, #tpu.memory_space<smem>>
      %33 = arith.index_cast %32 : i32 to index
      %c0_15 = arith.constant 0 : index
      %34 = vector.load %arg2[%33, %c0_15] : memref<15000x64xf32, #tpu.memory_space<vmem>>, vector<1x64xf32>
      %35 = arith.addf %29, %34 : vector<1x64xf32>
      %c4_i32 = arith.constant 4 : i32
      %36 = arith.addi %13, %c4_i32 : i32
      %37 = arith.index_cast %36 : i32 to index
      %38 = memref.load %arg1[%37] : memref<384xi32, #tpu.memory_space<smem>>
      %39 = arith.index_cast %38 : i32 to index
      %c0_16 = arith.constant 0 : index
      %40 = vector.load %arg2[%39, %c0_16] : memref<15000x64xf32, #tpu.memory_space<vmem>>, vector<1x64xf32>
      %41 = arith.addf %35, %40 : vector<1x64xf32>
      %c5_i32 = arith.constant 5 : i32
      %42 = arith.addi %13, %c5_i32 : i32
      %43 = arith.index_cast %42 : i32 to index
      %44 = memref.load %arg1[%43] : memref<384xi32, #tpu.memory_space<smem>>
      %45 = arith.index_cast %44 : i32 to index
      %c0_17 = arith.constant 0 : index
      %46 = vector.load %arg2[%45, %c0_17] : memref<15000x64xf32, #tpu.memory_space<vmem>>, vector<1x64xf32>
      %47 = arith.addf %41, %46 : vector<1x64xf32>
      %c6_i32 = arith.constant 6 : i32
      %48 = arith.addi %13, %c6_i32 : i32
      %49 = arith.index_cast %48 : i32 to index
      %50 = memref.load %arg1[%49] : memref<384xi32, #tpu.memory_space<smem>>
      %51 = arith.index_cast %50 : i32 to index
      %c0_18 = arith.constant 0 : index
      %52 = vector.load %arg2[%51, %c0_18] : memref<15000x64xf32, #tpu.memory_space<vmem>>, vector<1x64xf32>
      %53 = arith.addf %47, %52 : vector<1x64xf32>
      %c7_i32 = arith.constant 7 : i32
      %54 = arith.addi %13, %c7_i32 : i32
      %55 = arith.index_cast %54 : i32 to index
      %56 = memref.load %arg1[%55] : memref<384xi32, #tpu.memory_space<smem>>
      %57 = arith.index_cast %56 : i32 to index
      %c0_19 = arith.constant 0 : index
      %58 = vector.load %arg2[%57, %c0_19] : memref<15000x64xf32, #tpu.memory_space<vmem>>, vector<1x64xf32>
      %59 = arith.addf %53, %58 : vector<1x64xf32>
      %c8_i32_20 = arith.constant 8 : i32
      %60 = arith.addi %13, %c8_i32_20 : i32
      %61 = arith.index_cast %60 : i32 to index
      %62 = memref.load %arg1[%61] : memref<384xi32, #tpu.memory_space<smem>>
      %63 = arith.index_cast %62 : i32 to index
      %c0_21 = arith.constant 0 : index
      %64 = vector.load %arg2[%63, %c0_21] : memref<15000x64xf32, #tpu.memory_space<vmem>>, vector<1x64xf32>
      %65 = arith.addf %59, %64 : vector<1x64xf32>
      %c9_i32 = arith.constant 9 : i32
      %66 = arith.addi %13, %c9_i32 : i32
      %67 = arith.index_cast %66 : i32 to index
      %68 = memref.load %arg1[%67] : memref<384xi32, #tpu.memory_space<smem>>
      %69 = arith.index_cast %68 : i32 to index
      %c0_22 = arith.constant 0 : index
      %70 = vector.load %arg2[%69, %c0_22] : memref<15000x64xf32, #tpu.memory_space<vmem>>, vector<1x64xf32>
      %71 = arith.addf %65, %70 : vector<1x64xf32>
      %c10_i32 = arith.constant 10 : i32
      %72 = arith.addi %13, %c10_i32 : i32
      %73 = arith.index_cast %72 : i32 to index
      %74 = memref.load %arg1[%73] : memref<384xi32, #tpu.memory_space<smem>>
      %75 = arith.index_cast %74 : i32 to index
      %c0_23 = arith.constant 0 : index
      %76 = vector.load %arg2[%75, %c0_23] : memref<15000x64xf32, #tpu.memory_space<vmem>>, vector<1x64xf32>
      %77 = arith.addf %71, %76 : vector<1x64xf32>
      %c11_i32 = arith.constant 11 : i32
      %78 = arith.addi %13, %c11_i32 : i32
      %79 = arith.index_cast %78 : i32 to index
      %80 = memref.load %arg1[%79] : memref<384xi32, #tpu.memory_space<smem>>
      %81 = arith.index_cast %80 : i32 to index
      %c0_24 = arith.constant 0 : index
      %82 = vector.load %arg2[%81, %c0_24] : memref<15000x64xf32, #tpu.memory_space<vmem>>, vector<1x64xf32>
      %83 = arith.addf %77, %82 : vector<1x64xf32>
      %c12_i32 = arith.constant 12 : i32
      %84 = arith.addi %13, %c12_i32 : i32
      %85 = arith.index_cast %84 : i32 to index
      %86 = memref.load %arg1[%85] : memref<384xi32, #tpu.memory_space<smem>>
      %87 = arith.index_cast %86 : i32 to index
      %c0_25 = arith.constant 0 : index
      %88 = vector.load %arg2[%87, %c0_25] : memref<15000x64xf32, #tpu.memory_space<vmem>>, vector<1x64xf32>
      %89 = arith.addf %83, %88 : vector<1x64xf32>
      %c13_i32 = arith.constant 13 : i32
      %90 = arith.addi %13, %c13_i32 : i32
      %91 = arith.index_cast %90 : i32 to index
      %92 = memref.load %arg1[%91] : memref<384xi32, #tpu.memory_space<smem>>
      %93 = arith.index_cast %92 : i32 to index
      %c0_26 = arith.constant 0 : index
      %94 = vector.load %arg2[%93, %c0_26] : memref<15000x64xf32, #tpu.memory_space<vmem>>, vector<1x64xf32>
      %95 = arith.addf %89, %94 : vector<1x64xf32>
      %c14_i32 = arith.constant 14 : i32
      %96 = arith.addi %13, %c14_i32 : i32
      %97 = arith.index_cast %96 : i32 to index
      %98 = memref.load %arg1[%97] : memref<384xi32, #tpu.memory_space<smem>>
      %99 = arith.index_cast %98 : i32 to index
      %c0_27 = arith.constant 0 : index
      %100 = vector.load %arg2[%99, %c0_27] : memref<15000x64xf32, #tpu.memory_space<vmem>>, vector<1x64xf32>
      %101 = arith.addf %95, %100 : vector<1x64xf32>
      %c15_i32 = arith.constant 15 : i32
      %102 = arith.addi %13, %c15_i32 : i32
      %103 = arith.index_cast %102 : i32 to index
      %104 = memref.load %arg1[%103] : memref<384xi32, #tpu.memory_space<smem>>
      %105 = arith.index_cast %104 : i32 to index
      %c0_28 = arith.constant 0 : index
      %106 = vector.load %arg2[%105, %c0_28] : memref<15000x64xf32, #tpu.memory_space<vmem>>, vector<1x64xf32>
      %107 = arith.addf %101, %106 : vector<1x64xf32>
      %c8_i32_29 = arith.constant 8 : i32
      %108 = arith.muli %arg7, %c8_i32_29 : i32
      %109 = arith.addi %0, %108 : i32
      %c1_i32_30 = arith.constant 1 : i32
      %110 = arith.addi %109, %c1_i32_30 : i32
      %c16_i32_31 = arith.constant 16 : i32
      %111 = arith.muli %110, %c16_i32_31 : i32
      %112 = arith.index_cast %111 : i32 to index
      %113 = memref.load %arg1[%112] : memref<384xi32, #tpu.memory_space<smem>>
      %114 = arith.index_cast %113 : i32 to index
      %c0_32 = arith.constant 0 : index
      %115 = vector.load %arg2[%114, %c0_32] : memref<15000x64xf32, #tpu.memory_space<vmem>>, vector<1x64xf32>
      %c1_i32_33 = arith.constant 1 : i32
      %116 = arith.addi %111, %c1_i32_33 : i32
      %117 = arith.index_cast %116 : i32 to index
      %118 = memref.load %arg1[%117] : memref<384xi32, #tpu.memory_space<smem>>
      %119 = arith.index_cast %118 : i32 to index
      %c0_34 = arith.constant 0 : index
      %120 = vector.load %arg2[%119, %c0_34] : memref<15000x64xf32, #tpu.memory_space<vmem>>, vector<1x64xf32>
      %121 = arith.addf %115, %120 : vector<1x64xf32>
      %c2_i32_35 = arith.constant 2 : i32
      %122 = arith.addi %111, %c2_i32_35 : i32
      %123 = arith.index_cast %122 : i32 to index
      %124 = memref.load %arg1[%123] : memref<384xi32, #tpu.memory_space<smem>>
      %125 = arith.index_cast %124 : i32 to index
      %c0_36 = arith.constant 0 : index
      %126 = vector.load %arg2[%125, %c0_36] : memref<15000x64xf32, #tpu.memory_space<vmem>>, vector<1x64xf32>
      %127 = arith.addf %121, %126 : vector<1x64xf32>
      %c3_i32_37 = arith.constant 3 : i32
      %128 = arith.addi %111, %c3_i32_37 : i32
      %129 = arith.index_cast %128 : i32 to index
      %130 = memref.load %arg1[%129] : memref<384xi32, #tpu.memory_space<smem>>
      %131 = arith.index_cast %130 : i32 to index
      %c0_38 = arith.constant 0 : index
      %132 = vector.load %arg2[%131, %c0_38] : memref<15000x64xf32, #tpu.memory_space<vmem>>, vector<1x64xf32>
      %133 = arith.addf %127, %132 : vector<1x64xf32>
      %c4_i32_39 = arith.constant 4 : i32
      %134 = arith.addi %111, %c4_i32_39 : i32
      %135 = arith.index_cast %134 : i32 to index
      %136 = memref.load %arg1[%135] : memref<384xi32, #tpu.memory_space<smem>>
      %137 = arith.index_cast %136 : i32 to index
      %c0_40 = arith.constant 0 : index
      %138 = vector.load %arg2[%137, %c0_40] : memref<15000x64xf32, #tpu.memory_space<vmem>>, vector<1x64xf32>
      %139 = arith.addf %133, %138 : vector<1x64xf32>
      %c5_i32_41 = arith.constant 5 : i32
      %140 = arith.addi %111, %c5_i32_41 : i32
      %141 = arith.index_cast %140 : i32 to index
      %142 = memref.load %arg1[%141] : memref<384xi32, #tpu.memory_space<smem>>
      %143 = arith.index_cast %142 : i32 to index
      %c0_42 = arith.constant 0 : index
      %144 = vector.load %arg2[%143, %c0_42] : memref<15000x64xf32, #tpu.memory_space<vmem>>, vector<1x64xf32>
      %145 = arith.addf %139, %144 : vector<1x64xf32>
      %c6_i32_43 = arith.constant 6 : i32
      %146 = arith.addi %111, %c6_i32_43 : i32
      %147 = arith.index_cast %146 : i32 to index
      %148 = memref.load %arg1[%147] : memref<384xi32, #tpu.memory_space<smem>>
      %149 = arith.index_cast %148 : i32 to index
      %c0_44 = arith.constant 0 : index
      %150 = vector.load %arg2[%149, %c0_44] : memref<15000x64xf32, #tpu.memory_space<vmem>>, vector<1x64xf32>
      %151 = arith.addf %145, %150 : vector<1x64xf32>
      %c7_i32_45 = arith.constant 7 : i32
      %152 = arith.addi %111, %c7_i32_45 : i32
      %153 = arith.index_cast %152 : i32 to index
      %154 = memref.load %arg1[%153] : memref<384xi32, #tpu.memory_space<smem>>
      %155 = arith.index_cast %154 : i32 to index
      %c0_46 = arith.constant 0 : index
      %156 = vector.load %arg2[%155, %c0_46] : memref<15000x64xf32, #tpu.memory_space<vmem>>, vector<1x64xf32>
      %157 = arith.addf %151, %156 : vector<1x64xf32>
      %c8_i32_47 = arith.constant 8 : i32
      %158 = arith.addi %111, %c8_i32_47 : i32
      %159 = arith.index_cast %158 : i32 to index
      %160 = memref.load %arg1[%159] : memref<384xi32, #tpu.memory_space<smem>>
      %161 = arith.index_cast %160 : i32 to index
      %c0_48 = arith.constant 0 : index
      %162 = vector.load %arg2[%161, %c0_48] : memref<15000x64xf32, #tpu.memory_space<vmem>>, vector<1x64xf32>
      %163 = arith.addf %157, %162 : vector<1x64xf32>
      %c9_i32_49 = arith.constant 9 : i32
      %164 = arith.addi %111, %c9_i32_49 : i32
      %165 = arith.index_cast %164 : i32 to index
      %166 = memref.load %arg1[%165] : memref<384xi32, #tpu.memory_space<smem>>
      %167 = arith.index_cast %166 : i32 to index
      %c0_50 = arith.constant 0 : index
      %168 = vector.load %arg2[%167, %c0_50] : memref<15000x64xf32, #tpu.memory_space<vmem>>, vector<1x64xf32>
      %169 = arith.addf %163, %168 : vector<1x64xf32>
      %c10_i32_51 = arith.constant 10 : i32
      %170 = arith.addi %111, %c10_i32_51 : i32
      %171 = arith.index_cast %170 : i32 to index
      %172 = memref.load %arg1[%171] : memref<384xi32, #tpu.memory_space<smem>>
      %173 = arith.index_cast %172 : i32 to index
      %c0_52 = arith.constant 0 : index
      %174 = vector.load %arg2[%173, %c0_52] : memref<15000x64xf32, #tpu.memory_space<vmem>>, vector<1x64xf32>
      %175 = arith.addf %169, %174 : vector<1x64xf32>
      %c11_i32_53 = arith.constant 11 : i32
      %176 = arith.addi %111, %c11_i32_53 : i32
      %177 = arith.index_cast %176 : i32 to index
      %178 = memref.load %arg1[%177] : memref<384xi32, #tpu.memory_space<smem>>
      %179 = arith.index_cast %178 : i32 to index
      %c0_54 = arith.constant 0 : index
      %180 = vector.load %arg2[%179, %c0_54] : memref<15000x64xf32, #tpu.memory_space<vmem>>, vector<1x64xf32>
      %181 = arith.addf %175, %180 : vector<1x64xf32>
      %c12_i32_55 = arith.constant 12 : i32
      %182 = arith.addi %111, %c12_i32_55 : i32
      %183 = arith.index_cast %182 : i32 to index
      %184 = memref.load %arg1[%183] : memref<384xi32, #tpu.memory_space<smem>>
      %185 = arith.index_cast %184 : i32 to index
      %c0_56 = arith.constant 0 : index
      %186 = vector.load %arg2[%185, %c0_56] : memref<15000x64xf32, #tpu.memory_space<vmem>>, vector<1x64xf32>
      %187 = arith.addf %181, %186 : vector<1x64xf32>
      %c13_i32_57 = arith.constant 13 : i32
      %188 = arith.addi %111, %c13_i32_57 : i32
      %189 = arith.index_cast %188 : i32 to index
      %190 = memref.load %arg1[%189] : memref<384xi32, #tpu.memory_space<smem>>
      %191 = arith.index_cast %190 : i32 to index
      %c0_58 = arith.constant 0 : index
      %192 = vector.load %arg2[%191, %c0_58] : memref<15000x64xf32, #tpu.memory_space<vmem>>, vector<1x64xf32>
      %193 = arith.addf %187, %192 : vector<1x64xf32>
      %c14_i32_59 = arith.constant 14 : i32
      %194 = arith.addi %111, %c14_i32_59 : i32
      %195 = arith.index_cast %194 : i32 to index
      %196 = memref.load %arg1[%195] : memref<384xi32, #tpu.memory_space<smem>>
      %197 = arith.index_cast %196 : i32 to index
      %c0_60 = arith.constant 0 : index
      %198 = vector.load %arg2[%197, %c0_60] : memref<15000x64xf32, #tpu.memory_space<vmem>>, vector<1x64xf32>
      %199 = arith.addf %193, %198 : vector<1x64xf32>
      %c15_i32_61 = arith.constant 15 : i32
      %200 = arith.addi %111, %c15_i32_61 : i32
      %201 = arith.index_cast %200 : i32 to index
      %202 = memref.load %arg1[%201] : memref<384xi32, #tpu.memory_space<smem>>
      %203 = arith.index_cast %202 : i32 to index
      %c0_62 = arith.constant 0 : index
      %204 = vector.load %arg2[%203, %c0_62] : memref<15000x64xf32, #tpu.memory_space<vmem>>, vector<1x64xf32>
      %205 = arith.addf %199, %204 : vector<1x64xf32>
      %c8_i32_63 = arith.constant 8 : i32
      %206 = arith.muli %arg7, %c8_i32_63 : i32
      %207 = arith.addi %0, %206 : i32
      %c2_i32_64 = arith.constant 2 : i32
      %208 = arith.addi %207, %c2_i32_64 : i32
      %c16_i32_65 = arith.constant 16 : i32
      %209 = arith.muli %208, %c16_i32_65 : i32
      %210 = arith.index_cast %209 : i32 to index
      %211 = memref.load %arg1[%210] : memref<384xi32, #tpu.memory_space<smem>>
      %212 = arith.index_cast %211 : i32 to index
      %c0_66 = arith.constant 0 : index
      %213 = vector.load %arg2[%212, %c0_66] : memref<15000x64xf32, #tpu.memory_space<vmem>>, vector<1x64xf32>
      %c1_i32_67 = arith.constant 1 : i32
      %214 = arith.addi %209, %c1_i32_67 : i32
      %215 = arith.index_cast %214 : i32 to index
      %216 = memref.load %arg1[%215] : memref<384xi32, #tpu.memory_space<smem>>
      %217 = arith.index_cast %216 : i32 to index
      %c0_68 = arith.constant 0 : index
      %218 = vector.load %arg2[%217, %c0_68] : memref<15000x64xf32, #tpu.memory_space<vmem>>, vector<1x64xf32>
      %219 = arith.addf %213, %218 : vector<1x64xf32>
      %c2_i32_69 = arith.constant 2 : i32
      %220 = arith.addi %209, %c2_i32_69 : i32
      %221 = arith.index_cast %220 : i32 to index
      %222 = memref.load %arg1[%221] : memref<384xi32, #tpu.memory_space<smem>>
      %223 = arith.index_cast %222 : i32 to index
      %c0_70 = arith.constant 0 : index
      %224 = vector.load %arg2[%223, %c0_70] : memref<15000x64xf32, #tpu.memory_space<vmem>>, vector<1x64xf32>
      %225 = arith.addf %219, %224 : vector<1x64xf32>
      %c3_i32_71 = arith.constant 3 : i32
      %226 = arith.addi %209, %c3_i32_71 : i32
      %227 = arith.index_cast %226 : i32 to index
      %228 = memref.load %arg1[%227] : memref<384xi32, #tpu.memory_space<smem>>
      %229 = arith.index_cast %228 : i32 to index
      %c0_72 = arith.constant 0 : index
      %230 = vector.load %arg2[%229, %c0_72] : memref<15000x64xf32, #tpu.memory_space<vmem>>, vector<1x64xf32>
      %231 = arith.addf %225, %230 : vector<1x64xf32>
      %c4_i32_73 = arith.constant 4 : i32
      %232 = arith.addi %209, %c4_i32_73 : i32
      %233 = arith.index_cast %232 : i32 to index
      %234 = memref.load %arg1[%233] : memref<384xi32, #tpu.memory_space<smem>>
      %235 = arith.index_cast %234 : i32 to index
      %c0_74 = arith.constant 0 : index
      %236 = vector.load %arg2[%235, %c0_74] : memref<15000x64xf32, #tpu.memory_space<vmem>>, vector<1x64xf32>
      %237 = arith.addf %231, %236 : vector<1x64xf32>
      %c5_i32_75 = arith.constant 5 : i32
      %238 = arith.addi %209, %c5_i32_75 : i32
      %239 = arith.index_cast %238 : i32 to index
      %240 = memref.load %arg1[%239] : memref<384xi32, #tpu.memory_space<smem>>
      %241 = arith.index_cast %240 : i32 to index
      %c0_76 = arith.constant 0 : index
      %242 = vector.load %arg2[%241, %c0_76] : memref<15000x64xf32, #tpu.memory_space<vmem>>, vector<1x64xf32>
      %243 = arith.addf %237, %242 : vector<1x64xf32>
      %c6_i32_77 = arith.constant 6 : i32
      %244 = arith.addi %209, %c6_i32_77 : i32
      %245 = arith.index_cast %244 : i32 to index
      %246 = memref.load %arg1[%245] : memref<384xi32, #tpu.memory_space<smem>>
      %247 = arith.index_cast %246 : i32 to index
      %c0_78 = arith.constant 0 : index
      %248 = vector.load %arg2[%247, %c0_78] : memref<15000x64xf32, #tpu.memory_space<vmem>>, vector<1x64xf32>
      %249 = arith.addf %243, %248 : vector<1x64xf32>
      %c7_i32_79 = arith.constant 7 : i32
      %250 = arith.addi %209, %c7_i32_79 : i32
      %251 = arith.index_cast %250 : i32 to index
      %252 = memref.load %arg1[%251] : memref<384xi32, #tpu.memory_space<smem>>
      %253 = arith.index_cast %252 : i32 to index
      %c0_80 = arith.constant 0 : index
      %254 = vector.load %arg2[%253, %c0_80] : memref<15000x64xf32, #tpu.memory_space<vmem>>, vector<1x64xf32>
      %255 = arith.addf %249, %254 : vector<1x64xf32>
      %c8_i32_81 = arith.constant 8 : i32
      %256 = arith.addi %209, %c8_i32_81 : i32
      %257 = arith.index_cast %256 : i32 to index
      %258 = memref.load %arg1[%257] : memref<384xi32, #tpu.memory_space<smem>>
      %259 = arith.index_cast %258 : i32 to index
      %c0_82 = arith.constant 0 : index
      %260 = vector.load %arg2[%259, %c0_82] : memref<15000x64xf32, #tpu.memory_space<vmem>>, vector<1x64xf32>
      %261 = arith.addf %255, %260 : vector<1x64xf32>
      %c9_i32_83 = arith.constant 9 : i32
      %262 = arith.addi %209, %c9_i32_83 : i32
      %263 = arith.index_cast %262 : i32 to index
      %264 = memref.load %arg1[%263] : memref<384xi32, #tpu.memory_space<smem>>
      %265 = arith.index_cast %264 : i32 to index
      %c0_84 = arith.constant 0 : index
      %266 = vector.load %arg2[%265, %c0_84] : memref<15000x64xf32, #tpu.memory_space<vmem>>, vector<1x64xf32>
      %267 = arith.addf %261, %266 : vector<1x64xf32>
      %c10_i32_85 = arith.constant 10 : i32
      %268 = arith.addi %209, %c10_i32_85 : i32
      %269 = arith.index_cast %268 : i32 to index
      %270 = memref.load %arg1[%269] : memref<384xi32, #tpu.memory_space<smem>>
      %271 = arith.index_cast %270 : i32 to index
      %c0_86 = arith.constant 0 : index
      %272 = vector.load %arg2[%271, %c0_86] : memref<15000x64xf32, #tpu.memory_space<vmem>>, vector<1x64xf32>
      %273 = arith.addf %267, %272 : vector<1x64xf32>
      %c11_i32_87 = arith.constant 11 : i32
      %274 = arith.addi %209, %c11_i32_87 : i32
      %275 = arith.index_cast %274 : i32 to index
      %276 = memref.load %arg1[%275] : memref<384xi32, #tpu.memory_space<smem>>
      %277 = arith.index_cast %276 : i32 to index
      %c0_88 = arith.constant 0 : index
      %278 = vector.load %arg2[%277, %c0_88] : memref<15000x64xf32, #tpu.memory_space<vmem>>, vector<1x64xf32>
      %279 = arith.addf %273, %278 : vector<1x64xf32>
      %c12_i32_89 = arith.constant 12 : i32
      %280 = arith.addi %209, %c12_i32_89 : i32
      %281 = arith.index_cast %280 : i32 to index
      %282 = memref.load %arg1[%281] : memref<384xi32, #tpu.memory_space<smem>>
      %283 = arith.index_cast %282 : i32 to index
      %c0_90 = arith.constant 0 : index
      %284 = vector.load %arg2[%283, %c0_90] : memref<15000x64xf32, #tpu.memory_space<vmem>>, vector<1x64xf32>
      %285 = arith.addf %279, %284 : vector<1x64xf32>
      %c13_i32_91 = arith.constant 13 : i32
      %286 = arith.addi %209, %c13_i32_91 : i32
      %287 = arith.index_cast %286 : i32 to index
      %288 = memref.load %arg1[%287] : memref<384xi32, #tpu.memory_space<smem>>
      %289 = arith.index_cast %288 : i32 to index
      %c0_92 = arith.constant 0 : index
      %290 = vector.load %arg2[%289, %c0_92] : memref<15000x64xf32, #tpu.memory_space<vmem>>, vector<1x64xf32>
      %291 = arith.addf %285, %290 : vector<1x64xf32>
      %c14_i32_93 = arith.constant 14 : i32
      %292 = arith.addi %209, %c14_i32_93 : i32
      %293 = arith.index_cast %292 : i32 to index
      %294 = memref.load %arg1[%293] : memref<384xi32, #tpu.memory_space<smem>>
      %295 = arith.index_cast %294 : i32 to index
      %c0_94 = arith.constant 0 : index
      %296 = vector.load %arg2[%295, %c0_94] : memref<15000x64xf32, #tpu.memory_space<vmem>>, vector<1x64xf32>
      %297 = arith.addf %291, %296 : vector<1x64xf32>
      %c15_i32_95 = arith.constant 15 : i32
      %298 = arith.addi %209, %c15_i32_95 : i32
      %299 = arith.index_cast %298 : i32 to index
      %300 = memref.load %arg1[%299] : memref<384xi32, #tpu.memory_space<smem>>
      %301 = arith.index_cast %300 : i32 to index
      %c0_96 = arith.constant 0 : index
      %302 = vector.load %arg2[%301, %c0_96] : memref<15000x64xf32, #tpu.memory_space<vmem>>, vector<1x64xf32>
      %303 = arith.addf %297, %302 : vector<1x64xf32>
      %c8_i32_97 = arith.constant 8 : i32
      %304 = arith.muli %arg7, %c8_i32_97 : i32
      %305 = arith.addi %0, %304 : i32
      %c3_i32_98 = arith.constant 3 : i32
      %306 = arith.addi %305, %c3_i32_98 : i32
      %c16_i32_99 = arith.constant 16 : i32
      %307 = arith.muli %306, %c16_i32_99 : i32
      %308 = arith.index_cast %307 : i32 to index
      %309 = memref.load %arg1[%308] : memref<384xi32, #tpu.memory_space<smem>>
      %310 = arith.index_cast %309 : i32 to index
      %c0_100 = arith.constant 0 : index
      %311 = vector.load %arg2[%310, %c0_100] : memref<15000x64xf32, #tpu.memory_space<vmem>>, vector<1x64xf32>
      %c1_i32_101 = arith.constant 1 : i32
      %312 = arith.addi %307, %c1_i32_101 : i32
      %313 = arith.index_cast %312 : i32 to index
      %314 = memref.load %arg1[%313] : memref<384xi32, #tpu.memory_space<smem>>
      %315 = arith.index_cast %314 : i32 to index
      %c0_102 = arith.constant 0 : index
      %316 = vector.load %arg2[%315, %c0_102] : memref<15000x64xf32, #tpu.memory_space<vmem>>, vector<1x64xf32>
      %317 = arith.addf %311, %316 : vector<1x64xf32>
      %c2_i32_103 = arith.constant 2 : i32
      %318 = arith.addi %307, %c2_i32_103 : i32
      %319 = arith.index_cast %318 : i32 to index
      %320 = memref.load %arg1[%319] : memref<384xi32, #tpu.memory_space<smem>>
      %321 = arith.index_cast %320 : i32 to index
      %c0_104 = arith.constant 0 : index
      %322 = vector.load %arg2[%321, %c0_104] : memref<15000x64xf32, #tpu.memory_space<vmem>>, vector<1x64xf32>
      %323 = arith.addf %317, %322 : vector<1x64xf32>
      %c3_i32_105 = arith.constant 3 : i32
      %324 = arith.addi %307, %c3_i32_105 : i32
      %325 = arith.index_cast %324 : i32 to index
      %326 = memref.load %arg1[%325] : memref<384xi32, #tpu.memory_space<smem>>
      %327 = arith.index_cast %326 : i32 to index
      %c0_106 = arith.constant 0 : index
      %328 = vector.load %arg2[%327, %c0_106] : memref<15000x64xf32, #tpu.memory_space<vmem>>, vector<1x64xf32>
      %329 = arith.addf %323, %328 : vector<1x64xf32>
      %c4_i32_107 = arith.constant 4 : i32
      %330 = arith.addi %307, %c4_i32_107 : i32
      %331 = arith.index_cast %330 : i32 to index
      %332 = memref.load %arg1[%331] : memref<384xi32, #tpu.memory_space<smem>>
      %333 = arith.index_cast %332 : i32 to index
      %c0_108 = arith.constant 0 : index
      %334 = vector.load %arg2[%333, %c0_108] : memref<15000x64xf32, #tpu.memory_space<vmem>>, vector<1x64xf32>
      %335 = arith.addf %329, %334 : vector<1x64xf32>
      %c5_i32_109 = arith.constant 5 : i32
      %336 = arith.addi %307, %c5_i32_109 : i32
      %337 = arith.index_cast %336 : i32 to index
      %338 = memref.load %arg1[%337] : memref<384xi32, #tpu.memory_space<smem>>
      %339 = arith.index_cast %338 : i32 to index
      %c0_110 = arith.constant 0 : index
      %340 = vector.load %arg2[%339, %c0_110] : memref<15000x64xf32, #tpu.memory_space<vmem>>, vector<1x64xf32>
      %341 = arith.addf %335, %340 : vector<1x64xf32>
      %c6_i32_111 = arith.constant 6 : i32
      %342 = arith.addi %307, %c6_i32_111 : i32
      %343 = arith.index_cast %342 : i32 to index
      %344 = memref.load %arg1[%343] : memref<384xi32, #tpu.memory_space<smem>>
      %345 = arith.index_cast %344 : i32 to index
      %c0_112 = arith.constant 0 : index
      %346 = vector.load %arg2[%345, %c0_112] : memref<15000x64xf32, #tpu.memory_space<vmem>>, vector<1x64xf32>
      %347 = arith.addf %341, %346 : vector<1x64xf32>
      %c7_i32_113 = arith.constant 7 : i32
      %348 = arith.addi %307, %c7_i32_113 : i32
      %349 = arith.index_cast %348 : i32 to index
      %350 = memref.load %arg1[%349] : memref<384xi32, #tpu.memory_space<smem>>
      %351 = arith.index_cast %350 : i32 to index
      %c0_114 = arith.constant 0 : index
      %352 = vector.load %arg2[%351, %c0_114] : memref<15000x64xf32, #tpu.memory_space<vmem>>, vector<1x64xf32>
      %353 = arith.addf %347, %352 : vector<1x64xf32>
      %c8_i32_115 = arith.constant 8 : i32
      %354 = arith.addi %307, %c8_i32_115 : i32
      %355 = arith.index_cast %354 : i32 to index
      %356 = memref.load %arg1[%355] : memref<384xi32, #tpu.memory_space<smem>>
      %357 = arith.index_cast %356 : i32 to index
      %c0_116 = arith.constant 0 : index
      %358 = vector.load %arg2[%357, %c0_116] : memref<15000x64xf32, #tpu.memory_space<vmem>>, vector<1x64xf32>
      %359 = arith.addf %353, %358 : vector<1x64xf32>
      %c9_i32_117 = arith.constant 9 : i32
      %360 = arith.addi %307, %c9_i32_117 : i32
      %361 = arith.index_cast %360 : i32 to index
      %362 = memref.load %arg1[%361] : memref<384xi32, #tpu.memory_space<smem>>
      %363 = arith.index_cast %362 : i32 to index
      %c0_118 = arith.constant 0 : index
      %364 = vector.load %arg2[%363, %c0_118] : memref<15000x64xf32, #tpu.memory_space<vmem>>, vector<1x64xf32>
      %365 = arith.addf %359, %364 : vector<1x64xf32>
      %c10_i32_119 = arith.constant 10 : i32
      %366 = arith.addi %307, %c10_i32_119 : i32
      %367 = arith.index_cast %366 : i32 to index
      %368 = memref.load %arg1[%367] : memref<384xi32, #tpu.memory_space<smem>>
      %369 = arith.index_cast %368 : i32 to index
      %c0_120 = arith.constant 0 : index
      %370 = vector.load %arg2[%369, %c0_120] : memref<15000x64xf32, #tpu.memory_space<vmem>>, vector<1x64xf32>
      %371 = arith.addf %365, %370 : vector<1x64xf32>
      %c11_i32_121 = arith.constant 11 : i32
      %372 = arith.addi %307, %c11_i32_121 : i32
      %373 = arith.index_cast %372 : i32 to index
      %374 = memref.load %arg1[%373] : memref<384xi32, #tpu.memory_space<smem>>
      %375 = arith.index_cast %374 : i32 to index
      %c0_122 = arith.constant 0 : index
      %376 = vector.load %arg2[%375, %c0_122] : memref<15000x64xf32, #tpu.memory_space<vmem>>, vector<1x64xf32>
      %377 = arith.addf %371, %376 : vector<1x64xf32>
      %c12_i32_123 = arith.constant 12 : i32
      %378 = arith.addi %307, %c12_i32_123 : i32
      %379 = arith.index_cast %378 : i32 to index
      %380 = memref.load %arg1[%379] : memref<384xi32, #tpu.memory_space<smem>>
      %381 = arith.index_cast %380 : i32 to index
      %c0_124 = arith.constant 0 : index
      %382 = vector.load %arg2[%381, %c0_124] : memref<15000x64xf32, #tpu.memory_space<vmem>>, vector<1x64xf32>
      %383 = arith.addf %377, %382 : vector<1x64xf32>
      %c13_i32_125 = arith.constant 13 : i32
      %384 = arith.addi %307, %c13_i32_125 : i32
      %385 = arith.index_cast %384 : i32 to index
      %386 = memref.load %arg1[%385] : memref<384xi32, #tpu.memory_space<smem>>
      %387 = arith.index_cast %386 : i32 to index
      %c0_126 = arith.constant 0 : index
      %388 = vector.load %arg2[%387, %c0_126] : memref<15000x64xf32, #tpu.memory_space<vmem>>, vector<1x64xf32>
      %389 = arith.addf %383, %388 : vector<1x64xf32>
      %c14_i32_127 = arith.constant 14 : i32
      %390 = arith.addi %307, %c14_i32_127 : i32
      %391 = arith.index_cast %390 : i32 to index
      %392 = memref.load %arg1[%391] : memref<384xi32, #tpu.memory_space<smem>>
      %393 = arith.index_cast %392 : i32 to index
      %c0_128 = arith.constant 0 : index
      %394 = vector.load %arg2[%393, %c0_128] : memref<15000x64xf32, #tpu.memory_space<vmem>>, vector<1x64xf32>
      %395 = arith.addf %389, %394 : vector<1x64xf32>
      %c15_i32_129 = arith.constant 15 : i32
      %396 = arith.addi %307, %c15_i32_129 : i32
      %397 = arith.index_cast %396 : i32 to index
      %398 = memref.load %arg1[%397] : memref<384xi32, #tpu.memory_space<smem>>
      %399 = arith.index_cast %398 : i32 to index
      %c0_130 = arith.constant 0 : index
      %400 = vector.load %arg2[%399, %c0_130] : memref<15000x64xf32, #tpu.memory_space<vmem>>, vector<1x64xf32>
      %401 = arith.addf %395, %400 : vector<1x64xf32>
      %c8_i32_131 = arith.constant 8 : i32
      %402 = arith.muli %arg7, %c8_i32_131 : i32
      %403 = arith.addi %0, %402 : i32
      %c4_i32_132 = arith.constant 4 : i32
      %404 = arith.addi %403, %c4_i32_132 : i32
      %c16_i32_133 = arith.constant 16 : i32
      %405 = arith.muli %404, %c16_i32_133 : i32
      %406 = arith.index_cast %405 : i32 to index
      %407 = memref.load %arg1[%406] : memref<384xi32, #tpu.memory_space<smem>>
      %408 = arith.index_cast %407 : i32 to index
      %c0_134 = arith.constant 0 : index
      %409 = vector.load %arg2[%408, %c0_134] : memref<15000x64xf32, #tpu.memory_space<vmem>>, vector<1x64xf32>
      %c1_i32_135 = arith.constant 1 : i32
      %410 = arith.addi %405, %c1_i32_135 : i32
      %411 = arith.index_cast %410 : i32 to index
      %412 = memref.load %arg1[%411] : memref<384xi32, #tpu.memory_space<smem>>
      %413 = arith.index_cast %412 : i32 to index
      %c0_136 = arith.constant 0 : index
      %414 = vector.load %arg2[%413, %c0_136] : memref<15000x64xf32, #tpu.memory_space<vmem>>, vector<1x64xf32>
      %415 = arith.addf %409, %414 : vector<1x64xf32>
      %c2_i32_137 = arith.constant 2 : i32
      %416 = arith.addi %405, %c2_i32_137 : i32
      %417 = arith.index_cast %416 : i32 to index
      %418 = memref.load %arg1[%417] : memref<384xi32, #tpu.memory_space<smem>>
      %419 = arith.index_cast %418 : i32 to index
      %c0_138 = arith.constant 0 : index
      %420 = vector.load %arg2[%419, %c0_138] : memref<15000x64xf32, #tpu.memory_space<vmem>>, vector<1x64xf32>
      %421 = arith.addf %415, %420 : vector<1x64xf32>
      %c3_i32_139 = arith.constant 3 : i32
      %422 = arith.addi %405, %c3_i32_139 : i32
      %423 = arith.index_cast %422 : i32 to index
      %424 = memref.load %arg1[%423] : memref<384xi32, #tpu.memory_space<smem>>
      %425 = arith.index_cast %424 : i32 to index
      %c0_140 = arith.constant 0 : index
      %426 = vector.load %arg2[%425, %c0_140] : memref<15000x64xf32, #tpu.memory_space<vmem>>, vector<1x64xf32>
      %427 = arith.addf %421, %426 : vector<1x64xf32>
      %c4_i32_141 = arith.constant 4 : i32
      %428 = arith.addi %405, %c4_i32_141 : i32
      %429 = arith.index_cast %428 : i32 to index
      %430 = memref.load %arg1[%429] : memref<384xi32, #tpu.memory_space<smem>>
      %431 = arith.index_cast %430 : i32 to index
      %c0_142 = arith.constant 0 : index
      %432 = vector.load %arg2[%431, %c0_142] : memref<15000x64xf32, #tpu.memory_space<vmem>>, vector<1x64xf32>
      %433 = arith.addf %427, %432 : vector<1x64xf32>
      %c5_i32_143 = arith.constant 5 : i32
      %434 = arith.addi %405, %c5_i32_143 : i32
      %435 = arith.index_cast %434 : i32 to index
      %436 = memref.load %arg1[%435] : memref<384xi32, #tpu.memory_space<smem>>
      %437 = arith.index_cast %436 : i32 to index
      %c0_144 = arith.constant 0 : index
      %438 = vector.load %arg2[%437, %c0_144] : memref<15000x64xf32, #tpu.memory_space<vmem>>, vector<1x64xf32>
      %439 = arith.addf %433, %438 : vector<1x64xf32>
      %c6_i32_145 = arith.constant 6 : i32
      %440 = arith.addi %405, %c6_i32_145 : i32
      %441 = arith.index_cast %440 : i32 to index
      %442 = memref.load %arg1[%441] : memref<384xi32, #tpu.memory_space<smem>>
      %443 = arith.index_cast %442 : i32 to index
      %c0_146 = arith.constant 0 : index
      %444 = vector.load %arg2[%443, %c0_146] : memref<15000x64xf32, #tpu.memory_space<vmem>>, vector<1x64xf32>
      %445 = arith.addf %439, %444 : vector<1x64xf32>
      %c7_i32_147 = arith.constant 7 : i32
      %446 = arith.addi %405, %c7_i32_147 : i32
      %447 = arith.index_cast %446 : i32 to index
      %448 = memref.load %arg1[%447] : memref<384xi32, #tpu.memory_space<smem>>
      %449 = arith.index_cast %448 : i32 to index
      %c0_148 = arith.constant 0 : index
      %450 = vector.load %arg2[%449, %c0_148] : memref<15000x64xf32, #tpu.memory_space<vmem>>, vector<1x64xf32>
      %451 = arith.addf %445, %450 : vector<1x64xf32>
      %c8_i32_149 = arith.constant 8 : i32
      %452 = arith.addi %405, %c8_i32_149 : i32
      %453 = arith.index_cast %452 : i32 to index
      %454 = memref.load %arg1[%453] : memref<384xi32, #tpu.memory_space<smem>>
      %455 = arith.index_cast %454 : i32 to index
      %c0_150 = arith.constant 0 : index
      %456 = vector.load %arg2[%455, %c0_150] : memref<15000x64xf32, #tpu.memory_space<vmem>>, vector<1x64xf32>
      %457 = arith.addf %451, %456 : vector<1x64xf32>
      %c9_i32_151 = arith.constant 9 : i32
      %458 = arith.addi %405, %c9_i32_151 : i32
      %459 = arith.index_cast %458 : i32 to index
      %460 = memref.load %arg1[%459] : memref<384xi32, #tpu.memory_space<smem>>
      %461 = arith.index_cast %460 : i32 to index
      %c0_152 = arith.constant 0 : index
      %462 = vector.load %arg2[%461, %c0_152] : memref<15000x64xf32, #tpu.memory_space<vmem>>, vector<1x64xf32>
      %463 = arith.addf %457, %462 : vector<1x64xf32>
      %c10_i32_153 = arith.constant 10 : i32
      %464 = arith.addi %405, %c10_i32_153 : i32
      %465 = arith.index_cast %464 : i32 to index
      %466 = memref.load %arg1[%465] : memref<384xi32, #tpu.memory_space<smem>>
      %467 = arith.index_cast %466 : i32 to index
      %c0_154 = arith.constant 0 : index
      %468 = vector.load %arg2[%467, %c0_154] : memref<15000x64xf32, #tpu.memory_space<vmem>>, vector<1x64xf32>
      %469 = arith.addf %463, %468 : vector<1x64xf32>
      %c11_i32_155 = arith.constant 11 : i32
      %470 = arith.addi %405, %c11_i32_155 : i32
      %471 = arith.index_cast %470 : i32 to index
      %472 = memref.load %arg1[%471] : memref<384xi32, #tpu.memory_space<smem>>
      %473 = arith.index_cast %472 : i32 to index
      %c0_156 = arith.constant 0 : index
      %474 = vector.load %arg2[%473, %c0_156] : memref<15000x64xf32, #tpu.memory_space<vmem>>, vector<1x64xf32>
      %475 = arith.addf %469, %474 : vector<1x64xf32>
      %c12_i32_157 = arith.constant 12 : i32
      %476 = arith.addi %405, %c12_i32_157 : i32
      %477 = arith.index_cast %476 : i32 to index
      %478 = memref.load %arg1[%477] : memref<384xi32, #tpu.memory_space<smem>>
      %479 = arith.index_cast %478 : i32 to index
      %c0_158 = arith.constant 0 : index
      %480 = vector.load %arg2[%479, %c0_158] : memref<15000x64xf32, #tpu.memory_space<vmem>>, vector<1x64xf32>
      %481 = arith.addf %475, %480 : vector<1x64xf32>
      %c13_i32_159 = arith.constant 13 : i32
      %482 = arith.addi %405, %c13_i32_159 : i32
      %483 = arith.index_cast %482 : i32 to index
      %484 = memref.load %arg1[%483] : memref<384xi32, #tpu.memory_space<smem>>
      %485 = arith.index_cast %484 : i32 to index
      %c0_160 = arith.constant 0 : index
      %486 = vector.load %arg2[%485, %c0_160] : memref<15000x64xf32, #tpu.memory_space<vmem>>, vector<1x64xf32>
      %487 = arith.addf %481, %486 : vector<1x64xf32>
      %c14_i32_161 = arith.constant 14 : i32
      %488 = arith.addi %405, %c14_i32_161 : i32
      %489 = arith.index_cast %488 : i32 to index
      %490 = memref.load %arg1[%489] : memref<384xi32, #tpu.memory_space<smem>>
      %491 = arith.index_cast %490 : i32 to index
      %c0_162 = arith.constant 0 : index
      %492 = vector.load %arg2[%491, %c0_162] : memref<15000x64xf32, #tpu.memory_space<vmem>>, vector<1x64xf32>
      %493 = arith.addf %487, %492 : vector<1x64xf32>
      %c15_i32_163 = arith.constant 15 : i32
      %494 = arith.addi %405, %c15_i32_163 : i32
      %495 = arith.index_cast %494 : i32 to index
      %496 = memref.load %arg1[%495] : memref<384xi32, #tpu.memory_space<smem>>
      %497 = arith.index_cast %496 : i32 to index
      %c0_164 = arith.constant 0 : index
      %498 = vector.load %arg2[%497, %c0_164] : memref<15000x64xf32, #tpu.memory_space<vmem>>, vector<1x64xf32>
      %499 = arith.addf %493, %498 : vector<1x64xf32>
      %c8_i32_165 = arith.constant 8 : i32
      %500 = arith.muli %arg7, %c8_i32_165 : i32
      %501 = arith.addi %0, %500 : i32
      %c5_i32_166 = arith.constant 5 : i32
      %502 = arith.addi %501, %c5_i32_166 : i32
      %c16_i32_167 = arith.constant 16 : i32
      %503 = arith.muli %502, %c16_i32_167 : i32
      %504 = arith.index_cast %503 : i32 to index
      %505 = memref.load %arg1[%504] : memref<384xi32, #tpu.memory_space<smem>>
      %506 = arith.index_cast %505 : i32 to index
      %c0_168 = arith.constant 0 : index
      %507 = vector.load %arg2[%506, %c0_168] : memref<15000x64xf32, #tpu.memory_space<vmem>>, vector<1x64xf32>
      %c1_i32_169 = arith.constant 1 : i32
      %508 = arith.addi %503, %c1_i32_169 : i32
      %509 = arith.index_cast %508 : i32 to index
      %510 = memref.load %arg1[%509] : memref<384xi32, #tpu.memory_space<smem>>
      %511 = arith.index_cast %510 : i32 to index
      %c0_170 = arith.constant 0 : index
      %512 = vector.load %arg2[%511, %c0_170] : memref<15000x64xf32, #tpu.memory_space<vmem>>, vector<1x64xf32>
      %513 = arith.addf %507, %512 : vector<1x64xf32>
      %c2_i32_171 = arith.constant 2 : i32
      %514 = arith.addi %503, %c2_i32_171 : i32
      %515 = arith.index_cast %514 : i32 to index
      %516 = memref.load %arg1[%515] : memref<384xi32, #tpu.memory_space<smem>>
      %517 = arith.index_cast %516 : i32 to index
      %c0_172 = arith.constant 0 : index
      %518 = vector.load %arg2[%517, %c0_172] : memref<15000x64xf32, #tpu.memory_space<vmem>>, vector<1x64xf32>
      %519 = arith.addf %513, %518 : vector<1x64xf32>
      %c3_i32_173 = arith.constant 3 : i32
      %520 = arith.addi %503, %c3_i32_173 : i32
      %521 = arith.index_cast %520 : i32 to index
      %522 = memref.load %arg1[%521] : memref<384xi32, #tpu.memory_space<smem>>
      %523 = arith.index_cast %522 : i32 to index
      %c0_174 = arith.constant 0 : index
      %524 = vector.load %arg2[%523, %c0_174] : memref<15000x64xf32, #tpu.memory_space<vmem>>, vector<1x64xf32>
      %525 = arith.addf %519, %524 : vector<1x64xf32>
      %c4_i32_175 = arith.constant 4 : i32
      %526 = arith.addi %503, %c4_i32_175 : i32
      %527 = arith.index_cast %526 : i32 to index
      %528 = memref.load %arg1[%527] : memref<384xi32, #tpu.memory_space<smem>>
      %529 = arith.index_cast %528 : i32 to index
      %c0_176 = arith.constant 0 : index
      %530 = vector.load %arg2[%529, %c0_176] : memref<15000x64xf32, #tpu.memory_space<vmem>>, vector<1x64xf32>
      %531 = arith.addf %525, %530 : vector<1x64xf32>
      %c5_i32_177 = arith.constant 5 : i32
      %532 = arith.addi %503, %c5_i32_177 : i32
      %533 = arith.index_cast %532 : i32 to index
      %534 = memref.load %arg1[%533] : memref<384xi32, #tpu.memory_space<smem>>
      %535 = arith.index_cast %534 : i32 to index
      %c0_178 = arith.constant 0 : index
      %536 = vector.load %arg2[%535, %c0_178] : memref<15000x64xf32, #tpu.memory_space<vmem>>, vector<1x64xf32>
      %537 = arith.addf %531, %536 : vector<1x64xf32>
      %c6_i32_179 = arith.constant 6 : i32
      %538 = arith.addi %503, %c6_i32_179 : i32
      %539 = arith.index_cast %538 : i32 to index
      %540 = memref.load %arg1[%539] : memref<384xi32, #tpu.memory_space<smem>>
      %541 = arith.index_cast %540 : i32 to index
      %c0_180 = arith.constant 0 : index
      %542 = vector.load %arg2[%541, %c0_180] : memref<15000x64xf32, #tpu.memory_space<vmem>>, vector<1x64xf32>
      %543 = arith.addf %537, %542 : vector<1x64xf32>
      %c7_i32_181 = arith.constant 7 : i32
      %544 = arith.addi %503, %c7_i32_181 : i32
      %545 = arith.index_cast %544 : i32 to index
      %546 = memref.load %arg1[%545] : memref<384xi32, #tpu.memory_space<smem>>
      %547 = arith.index_cast %546 : i32 to index
      %c0_182 = arith.constant 0 : index
      %548 = vector.load %arg2[%547, %c0_182] : memref<15000x64xf32, #tpu.memory_space<vmem>>, vector<1x64xf32>
      %549 = arith.addf %543, %548 : vector<1x64xf32>
      %c8_i32_183 = arith.constant 8 : i32
      %550 = arith.addi %503, %c8_i32_183 : i32
      %551 = arith.index_cast %550 : i32 to index
      %552 = memref.load %arg1[%551] : memref<384xi32, #tpu.memory_space<smem>>
      %553 = arith.index_cast %552 : i32 to index
      %c0_184 = arith.constant 0 : index
      %554 = vector.load %arg2[%553, %c0_184] : memref<15000x64xf32, #tpu.memory_space<vmem>>, vector<1x64xf32>
      %555 = arith.addf %549, %554 : vector<1x64xf32>
      %c9_i32_185 = arith.constant 9 : i32
      %556 = arith.addi %503, %c9_i32_185 : i32
      %557 = arith.index_cast %556 : i32 to index
      %558 = memref.load %arg1[%557] : memref<384xi32, #tpu.memory_space<smem>>
      %559 = arith.index_cast %558 : i32 to index
      %c0_186 = arith.constant 0 : index
      %560 = vector.load %arg2[%559, %c0_186] : memref<15000x64xf32, #tpu.memory_space<vmem>>, vector<1x64xf32>
      %561 = arith.addf %555, %560 : vector<1x64xf32>
      %c10_i32_187 = arith.constant 10 : i32
      %562 = arith.addi %503, %c10_i32_187 : i32
      %563 = arith.index_cast %562 : i32 to index
      %564 = memref.load %arg1[%563] : memref<384xi32, #tpu.memory_space<smem>>
      %565 = arith.index_cast %564 : i32 to index
      %c0_188 = arith.constant 0 : index
      %566 = vector.load %arg2[%565, %c0_188] : memref<15000x64xf32, #tpu.memory_space<vmem>>, vector<1x64xf32>
      %567 = arith.addf %561, %566 : vector<1x64xf32>
      %c11_i32_189 = arith.constant 11 : i32
      %568 = arith.addi %503, %c11_i32_189 : i32
      %569 = arith.index_cast %568 : i32 to index
      %570 = memref.load %arg1[%569] : memref<384xi32, #tpu.memory_space<smem>>
      %571 = arith.index_cast %570 : i32 to index
      %c0_190 = arith.constant 0 : index
      %572 = vector.load %arg2[%571, %c0_190] : memref<15000x64xf32, #tpu.memory_space<vmem>>, vector<1x64xf32>
      %573 = arith.addf %567, %572 : vector<1x64xf32>
      %c12_i32_191 = arith.constant 12 : i32
      %574 = arith.addi %503, %c12_i32_191 : i32
      %575 = arith.index_cast %574 : i32 to index
      %576 = memref.load %arg1[%575] : memref<384xi32, #tpu.memory_space<smem>>
      %577 = arith.index_cast %576 : i32 to index
      %c0_192 = arith.constant 0 : index
      %578 = vector.load %arg2[%577, %c0_192] : memref<15000x64xf32, #tpu.memory_space<vmem>>, vector<1x64xf32>
      %579 = arith.addf %573, %578 : vector<1x64xf32>
      %c13_i32_193 = arith.constant 13 : i32
      %580 = arith.addi %503, %c13_i32_193 : i32
      %581 = arith.index_cast %580 : i32 to index
      %582 = memref.load %arg1[%581] : memref<384xi32, #tpu.memory_space<smem>>
      %583 = arith.index_cast %582 : i32 to index
      %c0_194 = arith.constant 0 : index
      %584 = vector.load %arg2[%583, %c0_194] : memref<15000x64xf32, #tpu.memory_space<vmem>>, vector<1x64xf32>
      %585 = arith.addf %579, %584 : vector<1x64xf32>
      %c14_i32_195 = arith.constant 14 : i32
      %586 = arith.addi %503, %c14_i32_195 : i32
      %587 = arith.index_cast %586 : i32 to index
      %588 = memref.load %arg1[%587] : memref<384xi32, #tpu.memory_space<smem>>
      %589 = arith.index_cast %588 : i32 to index
      %c0_196 = arith.constant 0 : index
      %590 = vector.load %arg2[%589, %c0_196] : memref<15000x64xf32, #tpu.memory_space<vmem>>, vector<1x64xf32>
      %591 = arith.addf %585, %590 : vector<1x64xf32>
      %c15_i32_197 = arith.constant 15 : i32
      %592 = arith.addi %503, %c15_i32_197 : i32
      %593 = arith.index_cast %592 : i32 to index
      %594 = memref.load %arg1[%593] : memref<384xi32, #tpu.memory_space<smem>>
      %595 = arith.index_cast %594 : i32 to index
      %c0_198 = arith.constant 0 : index
      %596 = vector.load %arg2[%595, %c0_198] : memref<15000x64xf32, #tpu.memory_space<vmem>>, vector<1x64xf32>
      %597 = arith.addf %591, %596 : vector<1x64xf32>
      %c8_i32_199 = arith.constant 8 : i32
      %598 = arith.muli %arg7, %c8_i32_199 : i32
      %599 = arith.addi %0, %598 : i32
      %c6_i32_200 = arith.constant 6 : i32
      %600 = arith.addi %599, %c6_i32_200 : i32
      %c16_i32_201 = arith.constant 16 : i32
      %601 = arith.muli %600, %c16_i32_201 : i32
      %602 = arith.index_cast %601 : i32 to index
      %603 = memref.load %arg1[%602] : memref<384xi32, #tpu.memory_space<smem>>
      %604 = arith.index_cast %603 : i32 to index
      %c0_202 = arith.constant 0 : index
      %605 = vector.load %arg2[%604, %c0_202] : memref<15000x64xf32, #tpu.memory_space<vmem>>, vector<1x64xf32>
      %c1_i32_203 = arith.constant 1 : i32
      %606 = arith.addi %601, %c1_i32_203 : i32
      %607 = arith.index_cast %606 : i32 to index
      %608 = memref.load %arg1[%607] : memref<384xi32, #tpu.memory_space<smem>>
      %609 = arith.index_cast %608 : i32 to index
      %c0_204 = arith.constant 0 : index
      %610 = vector.load %arg2[%609, %c0_204] : memref<15000x64xf32, #tpu.memory_space<vmem>>, vector<1x64xf32>
      %611 = arith.addf %605, %610 : vector<1x64xf32>
      %c2_i32_205 = arith.constant 2 : i32
      %612 = arith.addi %601, %c2_i32_205 : i32
      %613 = arith.index_cast %612 : i32 to index
      %614 = memref.load %arg1[%613] : memref<384xi32, #tpu.memory_space<smem>>
      %615 = arith.index_cast %614 : i32 to index
      %c0_206 = arith.constant 0 : index
      %616 = vector.load %arg2[%615, %c0_206] : memref<15000x64xf32, #tpu.memory_space<vmem>>, vector<1x64xf32>
      %617 = arith.addf %611, %616 : vector<1x64xf32>
      %c3_i32_207 = arith.constant 3 : i32
      %618 = arith.addi %601, %c3_i32_207 : i32
      %619 = arith.index_cast %618 : i32 to index
      %620 = memref.load %arg1[%619] : memref<384xi32, #tpu.memory_space<smem>>
      %621 = arith.index_cast %620 : i32 to index
      %c0_208 = arith.constant 0 : index
      %622 = vector.load %arg2[%621, %c0_208] : memref<15000x64xf32, #tpu.memory_space<vmem>>, vector<1x64xf32>
      %623 = arith.addf %617, %622 : vector<1x64xf32>
      %c4_i32_209 = arith.constant 4 : i32
      %624 = arith.addi %601, %c4_i32_209 : i32
      %625 = arith.index_cast %624 : i32 to index
      %626 = memref.load %arg1[%625] : memref<384xi32, #tpu.memory_space<smem>>
      %627 = arith.index_cast %626 : i32 to index
      %c0_210 = arith.constant 0 : index
      %628 = vector.load %arg2[%627, %c0_210] : memref<15000x64xf32, #tpu.memory_space<vmem>>, vector<1x64xf32>
      %629 = arith.addf %623, %628 : vector<1x64xf32>
      %c5_i32_211 = arith.constant 5 : i32
      %630 = arith.addi %601, %c5_i32_211 : i32
      %631 = arith.index_cast %630 : i32 to index
      %632 = memref.load %arg1[%631] : memref<384xi32, #tpu.memory_space<smem>>
      %633 = arith.index_cast %632 : i32 to index
      %c0_212 = arith.constant 0 : index
      %634 = vector.load %arg2[%633, %c0_212] : memref<15000x64xf32, #tpu.memory_space<vmem>>, vector<1x64xf32>
      %635 = arith.addf %629, %634 : vector<1x64xf32>
      %c6_i32_213 = arith.constant 6 : i32
      %636 = arith.addi %601, %c6_i32_213 : i32
      %637 = arith.index_cast %636 : i32 to index
      %638 = memref.load %arg1[%637] : memref<384xi32, #tpu.memory_space<smem>>
      %639 = arith.index_cast %638 : i32 to index
      %c0_214 = arith.constant 0 : index
      %640 = vector.load %arg2[%639, %c0_214] : memref<15000x64xf32, #tpu.memory_space<vmem>>, vector<1x64xf32>
      %641 = arith.addf %635, %640 : vector<1x64xf32>
      %c7_i32_215 = arith.constant 7 : i32
      %642 = arith.addi %601, %c7_i32_215 : i32
      %643 = arith.index_cast %642 : i32 to index
      %644 = memref.load %arg1[%643] : memref<384xi32, #tpu.memory_space<smem>>
      %645 = arith.index_cast %644 : i32 to index
      %c0_216 = arith.constant 0 : index
      %646 = vector.load %arg2[%645, %c0_216] : memref<15000x64xf32, #tpu.memory_space<vmem>>, vector<1x64xf32>
      %647 = arith.addf %641, %646 : vector<1x64xf32>
      %c8_i32_217 = arith.constant 8 : i32
      %648 = arith.addi %601, %c8_i32_217 : i32
      %649 = arith.index_cast %648 : i32 to index
      %650 = memref.load %arg1[%649] : memref<384xi32, #tpu.memory_space<smem>>
      %651 = arith.index_cast %650 : i32 to index
      %c0_218 = arith.constant 0 : index
      %652 = vector.load %arg2[%651, %c0_218] : memref<15000x64xf32, #tpu.memory_space<vmem>>, vector<1x64xf32>
      %653 = arith.addf %647, %652 : vector<1x64xf32>
      %c9_i32_219 = arith.constant 9 : i32
      %654 = arith.addi %601, %c9_i32_219 : i32
      %655 = arith.index_cast %654 : i32 to index
      %656 = memref.load %arg1[%655] : memref<384xi32, #tpu.memory_space<smem>>
      %657 = arith.index_cast %656 : i32 to index
      %c0_220 = arith.constant 0 : index
      %658 = vector.load %arg2[%657, %c0_220] : memref<15000x64xf32, #tpu.memory_space<vmem>>, vector<1x64xf32>
      %659 = arith.addf %653, %658 : vector<1x64xf32>
      %c10_i32_221 = arith.constant 10 : i32
      %660 = arith.addi %601, %c10_i32_221 : i32
      %661 = arith.index_cast %660 : i32 to index
      %662 = memref.load %arg1[%661] : memref<384xi32, #tpu.memory_space<smem>>
      %663 = arith.index_cast %662 : i32 to index
      %c0_222 = arith.constant 0 : index
      %664 = vector.load %arg2[%663, %c0_222] : memref<15000x64xf32, #tpu.memory_space<vmem>>, vector<1x64xf32>
      %665 = arith.addf %659, %664 : vector<1x64xf32>
      %c11_i32_223 = arith.constant 11 : i32
      %666 = arith.addi %601, %c11_i32_223 : i32
      %667 = arith.index_cast %666 : i32 to index
      %668 = memref.load %arg1[%667] : memref<384xi32, #tpu.memory_space<smem>>
      %669 = arith.index_cast %668 : i32 to index
      %c0_224 = arith.constant 0 : index
      %670 = vector.load %arg2[%669, %c0_224] : memref<15000x64xf32, #tpu.memory_space<vmem>>, vector<1x64xf32>
      %671 = arith.addf %665, %670 : vector<1x64xf32>
      %c12_i32_225 = arith.constant 12 : i32
      %672 = arith.addi %601, %c12_i32_225 : i32
      %673 = arith.index_cast %672 : i32 to index
      %674 = memref.load %arg1[%673] : memref<384xi32, #tpu.memory_space<smem>>
      %675 = arith.index_cast %674 : i32 to index
      %c0_226 = arith.constant 0 : index
      %676 = vector.load %arg2[%675, %c0_226] : memref<15000x64xf32, #tpu.memory_space<vmem>>, vector<1x64xf32>
      %677 = arith.addf %671, %676 : vector<1x64xf32>
      %c13_i32_227 = arith.constant 13 : i32
      %678 = arith.addi %601, %c13_i32_227 : i32
      %679 = arith.index_cast %678 : i32 to index
      %680 = memref.load %arg1[%679] : memref<384xi32, #tpu.memory_space<smem>>
      %681 = arith.index_cast %680 : i32 to index
      %c0_228 = arith.constant 0 : index
      %682 = vector.load %arg2[%681, %c0_228] : memref<15000x64xf32, #tpu.memory_space<vmem>>, vector<1x64xf32>
      %683 = arith.addf %677, %682 : vector<1x64xf32>
      %c14_i32_229 = arith.constant 14 : i32
      %684 = arith.addi %601, %c14_i32_229 : i32
      %685 = arith.index_cast %684 : i32 to index
      %686 = memref.load %arg1[%685] : memref<384xi32, #tpu.memory_space<smem>>
      %687 = arith.index_cast %686 : i32 to index
      %c0_230 = arith.constant 0 : index
      %688 = vector.load %arg2[%687, %c0_230] : memref<15000x64xf32, #tpu.memory_space<vmem>>, vector<1x64xf32>
      %689 = arith.addf %683, %688 : vector<1x64xf32>
      %c15_i32_231 = arith.constant 15 : i32
      %690 = arith.addi %601, %c15_i32_231 : i32
      %691 = arith.index_cast %690 : i32 to index
      %692 = memref.load %arg1[%691] : memref<384xi32, #tpu.memory_space<smem>>
      %693 = arith.index_cast %692 : i32 to index
      %c0_232 = arith.constant 0 : index
      %694 = vector.load %arg2[%693, %c0_232] : memref<15000x64xf32, #tpu.memory_space<vmem>>, vector<1x64xf32>
      %695 = arith.addf %689, %694 : vector<1x64xf32>
      %c8_i32_233 = arith.constant 8 : i32
      %696 = arith.muli %arg7, %c8_i32_233 : i32
      %697 = arith.addi %0, %696 : i32
      %c7_i32_234 = arith.constant 7 : i32
      %698 = arith.addi %697, %c7_i32_234 : i32
      %c16_i32_235 = arith.constant 16 : i32
      %699 = arith.muli %698, %c16_i32_235 : i32
      %700 = arith.index_cast %699 : i32 to index
      %701 = memref.load %arg1[%700] : memref<384xi32, #tpu.memory_space<smem>>
      %702 = arith.index_cast %701 : i32 to index
      %c0_236 = arith.constant 0 : index
      %703 = vector.load %arg2[%702, %c0_236] : memref<15000x64xf32, #tpu.memory_space<vmem>>, vector<1x64xf32>
      %c1_i32_237 = arith.constant 1 : i32
      %704 = arith.addi %699, %c1_i32_237 : i32
      %705 = arith.index_cast %704 : i32 to index
      %706 = memref.load %arg1[%705] : memref<384xi32, #tpu.memory_space<smem>>
      %707 = arith.index_cast %706 : i32 to index
      %c0_238 = arith.constant 0 : index
      %708 = vector.load %arg2[%707, %c0_238] : memref<15000x64xf32, #tpu.memory_space<vmem>>, vector<1x64xf32>
      %709 = arith.addf %703, %708 : vector<1x64xf32>
      %c2_i32_239 = arith.constant 2 : i32
      %710 = arith.addi %699, %c2_i32_239 : i32
      %711 = arith.index_cast %710 : i32 to index
      %712 = memref.load %arg1[%711] : memref<384xi32, #tpu.memory_space<smem>>
      %713 = arith.index_cast %712 : i32 to index
      %c0_240 = arith.constant 0 : index
      %714 = vector.load %arg2[%713, %c0_240] : memref<15000x64xf32, #tpu.memory_space<vmem>>, vector<1x64xf32>
      %715 = arith.addf %709, %714 : vector<1x64xf32>
      %c3_i32_241 = arith.constant 3 : i32
      %716 = arith.addi %699, %c3_i32_241 : i32
      %717 = arith.index_cast %716 : i32 to index
      %718 = memref.load %arg1[%717] : memref<384xi32, #tpu.memory_space<smem>>
      %719 = arith.index_cast %718 : i32 to index
      %c0_242 = arith.constant 0 : index
      %720 = vector.load %arg2[%719, %c0_242] : memref<15000x64xf32, #tpu.memory_space<vmem>>, vector<1x64xf32>
      %721 = arith.addf %715, %720 : vector<1x64xf32>
      %c4_i32_243 = arith.constant 4 : i32
      %722 = arith.addi %699, %c4_i32_243 : i32
      %723 = arith.index_cast %722 : i32 to index
      %724 = memref.load %arg1[%723] : memref<384xi32, #tpu.memory_space<smem>>
      %725 = arith.index_cast %724 : i32 to index
      %c0_244 = arith.constant 0 : index
      %726 = vector.load %arg2[%725, %c0_244] : memref<15000x64xf32, #tpu.memory_space<vmem>>, vector<1x64xf32>
      %727 = arith.addf %721, %726 : vector<1x64xf32>
      %c5_i32_245 = arith.constant 5 : i32
      %728 = arith.addi %699, %c5_i32_245 : i32
      %729 = arith.index_cast %728 : i32 to index
      %730 = memref.load %arg1[%729] : memref<384xi32, #tpu.memory_space<smem>>
      %731 = arith.index_cast %730 : i32 to index
      %c0_246 = arith.constant 0 : index
      %732 = vector.load %arg2[%731, %c0_246] : memref<15000x64xf32, #tpu.memory_space<vmem>>, vector<1x64xf32>
      %733 = arith.addf %727, %732 : vector<1x64xf32>
      %c6_i32_247 = arith.constant 6 : i32
      %734 = arith.addi %699, %c6_i32_247 : i32
      %735 = arith.index_cast %734 : i32 to index
      %736 = memref.load %arg1[%735] : memref<384xi32, #tpu.memory_space<smem>>
      %737 = arith.index_cast %736 : i32 to index
      %c0_248 = arith.constant 0 : index
      %738 = vector.load %arg2[%737, %c0_248] : memref<15000x64xf32, #tpu.memory_space<vmem>>, vector<1x64xf32>
      %739 = arith.addf %733, %738 : vector<1x64xf32>
      %c7_i32_249 = arith.constant 7 : i32
      %740 = arith.addi %699, %c7_i32_249 : i32
      %741 = arith.index_cast %740 : i32 to index
      %742 = memref.load %arg1[%741] : memref<384xi32, #tpu.memory_space<smem>>
      %743 = arith.index_cast %742 : i32 to index
      %c0_250 = arith.constant 0 : index
      %744 = vector.load %arg2[%743, %c0_250] : memref<15000x64xf32, #tpu.memory_space<vmem>>, vector<1x64xf32>
      %745 = arith.addf %739, %744 : vector<1x64xf32>
      %c8_i32_251 = arith.constant 8 : i32
      %746 = arith.addi %699, %c8_i32_251 : i32
      %747 = arith.index_cast %746 : i32 to index
      %748 = memref.load %arg1[%747] : memref<384xi32, #tpu.memory_space<smem>>
      %749 = arith.index_cast %748 : i32 to index
      %c0_252 = arith.constant 0 : index
      %750 = vector.load %arg2[%749, %c0_252] : memref<15000x64xf32, #tpu.memory_space<vmem>>, vector<1x64xf32>
      %751 = arith.addf %745, %750 : vector<1x64xf32>
      %c9_i32_253 = arith.constant 9 : i32
      %752 = arith.addi %699, %c9_i32_253 : i32
      %753 = arith.index_cast %752 : i32 to index
      %754 = memref.load %arg1[%753] : memref<384xi32, #tpu.memory_space<smem>>
      %755 = arith.index_cast %754 : i32 to index
      %c0_254 = arith.constant 0 : index
      %756 = vector.load %arg2[%755, %c0_254] : memref<15000x64xf32, #tpu.memory_space<vmem>>, vector<1x64xf32>
      %757 = arith.addf %751, %756 : vector<1x64xf32>
      %c10_i32_255 = arith.constant 10 : i32
      %758 = arith.addi %699, %c10_i32_255 : i32
      %759 = arith.index_cast %758 : i32 to index
      %760 = memref.load %arg1[%759] : memref<384xi32, #tpu.memory_space<smem>>
      %761 = arith.index_cast %760 : i32 to index
      %c0_256 = arith.constant 0 : index
      %762 = vector.load %arg2[%761, %c0_256] : memref<15000x64xf32, #tpu.memory_space<vmem>>, vector<1x64xf32>
      %763 = arith.addf %757, %762 : vector<1x64xf32>
      %c11_i32_257 = arith.constant 11 : i32
      %764 = arith.addi %699, %c11_i32_257 : i32
      %765 = arith.index_cast %764 : i32 to index
      %766 = memref.load %arg1[%765] : memref<384xi32, #tpu.memory_space<smem>>
      %767 = arith.index_cast %766 : i32 to index
      %c0_258 = arith.constant 0 : index
      %768 = vector.load %arg2[%767, %c0_258] : memref<15000x64xf32, #tpu.memory_space<vmem>>, vector<1x64xf32>
      %769 = arith.addf %763, %768 : vector<1x64xf32>
      %c12_i32_259 = arith.constant 12 : i32
      %770 = arith.addi %699, %c12_i32_259 : i32
      %771 = arith.index_cast %770 : i32 to index
      %772 = memref.load %arg1[%771] : memref<384xi32, #tpu.memory_space<smem>>
      %773 = arith.index_cast %772 : i32 to index
      %c0_260 = arith.constant 0 : index
      %774 = vector.load %arg2[%773, %c0_260] : memref<15000x64xf32, #tpu.memory_space<vmem>>, vector<1x64xf32>
      %775 = arith.addf %769, %774 : vector<1x64xf32>
      %c13_i32_261 = arith.constant 13 : i32
      %776 = arith.addi %699, %c13_i32_261 : i32
      %777 = arith.index_cast %776 : i32 to index
      %778 = memref.load %arg1[%777] : memref<384xi32, #tpu.memory_space<smem>>
      %779 = arith.index_cast %778 : i32 to index
      %c0_262 = arith.constant 0 : index
      %780 = vector.load %arg2[%779, %c0_262] : memref<15000x64xf32, #tpu.memory_space<vmem>>, vector<1x64xf32>
      %781 = arith.addf %775, %780 : vector<1x64xf32>
      %c14_i32_263 = arith.constant 14 : i32
      %782 = arith.addi %699, %c14_i32_263 : i32
      %783 = arith.index_cast %782 : i32 to index
      %784 = memref.load %arg1[%783] : memref<384xi32, #tpu.memory_space<smem>>
      %785 = arith.index_cast %784 : i32 to index
      %c0_264 = arith.constant 0 : index
      %786 = vector.load %arg2[%785, %c0_264] : memref<15000x64xf32, #tpu.memory_space<vmem>>, vector<1x64xf32>
      %787 = arith.addf %781, %786 : vector<1x64xf32>
      %c15_i32_265 = arith.constant 15 : i32
      %788 = arith.addi %699, %c15_i32_265 : i32
      %789 = arith.index_cast %788 : i32 to index
      %790 = memref.load %arg1[%789] : memref<384xi32, #tpu.memory_space<smem>>
      %791 = arith.index_cast %790 : i32 to index
      %c0_266 = arith.constant 0 : index
      %792 = vector.load %arg2[%791, %c0_266] : memref<15000x64xf32, #tpu.memory_space<vmem>>, vector<1x64xf32>
      %793 = arith.addf %787, %792 : vector<1x64xf32>
      %794 = tpu.concatenate %107, %205, %303, %401, %499, %597, %695, %793 in 0 : vector<1x64xf32>, vector<1x64xf32>, vector<1x64xf32>, vector<1x64xf32>, vector<1x64xf32>, vector<1x64xf32>, vector<1x64xf32>, vector<1x64xf32> -> vector<8x64xf32>
      %795 = arith.index_cast %arg7 : i32 to index
      %c0_267 = arith.constant 0 : index
      %c0_268 = arith.constant 0 : index
      %796 = vector.load %arg6[%795, %c0_267, %c0_268] : memref<3x8x64xf32, #tpu.memory_space<vmem>>, vector<1x8x64xf32>
      %797 = vector.shape_cast %796 : vector<1x8x64xf32> to vector<8x64xf32>
      %798 = vector.shape_cast %794 : vector<8x64xf32> to vector<1x8x64xf32>
      tpu.vector_store %arg6[%795, %c0_267, %c0_268], %798 {strides = array<i32>} : memref<3x8x64xf32, #tpu.memory_space<vmem>>, vector<1x8x64xf32>,
    }
    %c3_i32_0 = arith.constant 3 : i32
    %c0 = arith.constant 0 : index
    %c0_1 = arith.constant 0 : index
    %c0_2 = arith.constant 0 : index
    %2 = vector.load %arg6[%c0, %c0_1, %c0_2] : memref<3x8x64xf32, #tpu.memory_space<vmem>>, vector<3x8x64xf32>
    %3 = vector.shape_cast %2 : vector<3x8x64xf32> to vector<24x64xf32>
    %c0_3 = arith.constant 0 : index
    %c0_4 = arith.constant 0 : index
    %4 = vector.load %arg3[%c0_3, %c0_4] : memref<64x128xf32, #tpu.memory_space<vmem>>, vector<64x128xf32>
    %cst = arith.constant dense<0.000000e+00> : vector<24x128xf32>
    %5 = tpu.matmul %3, %4, %cst {dimension_numbers = #tpu.dot_dimension_numbers<[1], [0], [0], [1], [0, 0, 1, 1], [], []>} : vector<24x64xf32>, vector<64x128xf32>, vector<24x128xf32> -> vector<24x128xf32>
    %c0_5 = arith.constant 0 : index
    %c0_6 = arith.constant 0 : index
    %6 = vector.load %arg4[%c0_5, %c0_6] : memref<1x128xf32, #tpu.memory_space<vmem>>, vector<1x128xf32>
    %7 = vector.broadcast %6 : vector<1x128xf32> to vector<24x128xf32>
    %8 = arith.addf %5, %7 : vector<24x128xf32>
    %c0_7 = arith.constant 0 : index
    %c0_8 = arith.constant 0 : index
    %9 = vector.load %arg5[%c0_7, %c0_8] : memref<24x128xf32, #tpu.memory_space<vmem>>, vector<24x128xf32>
    tpu.vector_store %arg5[%c0_7, %c0_8], %8 {strides = array<i32>} : memref<24x128xf32, #tpu.memory_space<vmem>>, vector<24x128xf32>,
    return
  }
  func.func @transform_0(%arg0: i32, %arg1: memref<384xi32, #tpu.memory_space<smem>>) -> (i32, i32) {
    %c0_i32 = arith.constant 0 : i32
    %c0_i32_0 = arith.constant 0 : i32
    %c0_i32_1 = arith.constant 0 : i32
    return %c0_i32, %c0_i32_0 : i32, i32
  }
  func.func @transform_1(%arg0: i32, %arg1: memref<384xi32, #tpu.memory_space<smem>>) -> (i32, i32) {
    %c0_i32 = arith.constant 0 : i32
    %c0_i32_0 = arith.constant 0 : i32
    %c0_i32_1 = arith.constant 0 : i32
    return %c0_i32, %c0_i32_0 : i32, i32
  }
  func.func @transform_2(%arg0: i32, %arg1: memref<384xi32, #tpu.memory_space<smem>>) -> (i32, i32) {
    %c0_i32 = arith.constant 0 : i32
    %c0_i32_0 = arith.constant 0 : i32
    %c0_i32_1 = arith.constant 0 : i32
    return %c0_i32, %c0_i32_0 : i32, i32
  }
  func.func @transform_3(%arg0: i32, %arg1: memref<384xi32, #tpu.memory_space<smem>>) -> (i32, i32) {
    %c0_i32 = arith.constant 0 : i32
    %c0_i32_0 = arith.constant 0 : i32
    return %arg0, %c0_i32 : i32, i32
  }
}

</mosaic_0001>

<bundles_post_ra>
// kernel: tpu_custom_call.1
= control target key start
LH: loop header
LB: loop body
LE: loop exit
PB: predicated region body
PF: predicated region fallthrough
CT: control target
= control target key end

     0   :  { %s2632_s0 = inlined_call_operand.vmem [shape: s32[384], index: 0, kind: input, shape index: {}]   ;;  %s2633_s1 = inlined_call_operand.vmem [shape: f32[15000,64], index: 1, kind: input, shape index: {}]   ;;  %s2634_s2 = inlined_call_operand.vmem [shape: f32[64,128], index: 2, kind: input, shape index: {}]   ;;  %s2635_s3 = inlined_call_operand.vmem [shape: f32[1,128], index: 3, kind: input, shape index: {}]   ;;  %s2636_s4 = inlined_call_operand.hbm [shape: f32[24,128], index: 4, kind: output, shape index: {}]  }
   0x1   :  { %2725 = sst [smem:[#allocation86_spill]] %s2634_s2  ;;  %s9_s17 = sshll.u32 %s2632_s0, 4  ;;  %s10_s17 = int_to_ptr.vmem [resolvable:$true] %s9_s17 }
   0x2   :  { %2726 = sst [smem:[#allocation87_spill]] %s2635_s3  ;;  %s1076_s18 = scalar_lea.vmem %s10_s17, 48 }
   0x3   :  { %2727 = sst [smem:[#allocation88_spill]] %s2636_s4  ;;  %p1077_p0 = scmp.ne.s32.totalorder %s10_s17, %s1076_s18 }
   0x4   :  { %s1080_s19 = scalar_lea.vmem %s10_s17, 64  ;;  %p1081_p1 = scmp.lt.s32.totalorder %s10_s17, %s10_s17 }
   0x5   :  { %p1082_p2 = scmp.lt.s32.totalorder %s1080_s19, %s1076_s18 }
   0x7   :  { %p1083_p3 = por %p1082_p2, %p1081_p1 }
   0x9   :  { %p1084_p4 = pnand %p1083_p3, %p1077_p0 }
   0xb   :  { %1087 = shalt.err (!%p1084_p4)  }
   0xc   :  { %s1122_s20 = smov [#allocation4]  }
   0xd   :  { %12 = dma.vmem_to_smem %s10_s17, 48, %s1122_s20, [#allocation3] }
   0xe   :  { %1114 = dma.done.wait [#allocation3], 48 }
   0xf   :  { %1115 = vsyncadd [#allocation3], 4294967248 }
  0x10   :  { %14 = sfence }
  0x11   :  { %15 = vsyncpa [#allocation6], 0  ;;  %s1157_s21 = smov 0  }
  0x12 LB: > { %2728 = sst [smem:[#allocation9_spill]] %s1120_s21  ;;  %s1163_s0 = sshll.u32 %s1120_s21, 7  ;;  %vm691_vm0 = vcmask 1040384   ;;  %vm693_vm1 = vcmask 1041408   ;;  %vm695_vm2 = vcmask 1042432   ;;  %vm697_vm3 = vcmask 1043456   ;;  %s1120_s21 = sphi %s1157_s21, %s28_s21  }
  0x13   : > { %2729 = sst [smem:[#allocation10_spill]] %s1163_s0  ;;  %s35_s23 = sadd.s32 1, %s1163_s0  ;;  %vm699_vm4 = vcmask 1044480   ;;  %vm701_vm5 = vcmask 1045504   ;;  %vm703_vm6 = vcmask 1046528   ;;  %vm706_vm7 = vcmask 523264  }
  0x14   : > { %s1166_s22 = sld [smem:[#allocation4 + %s1163_s0]]  ;;  %s40_s25 = sadd.s32 2, %s1163_s0 }
  0x15   : > { %s1169_s24 = sld [smem:[#allocation4 + %s35_s23]]  ;;  %s45_s27 = sadd.s32 3, %s1163_s0 }
  0x16   : > { %s1172_s26 = sld [smem:[#allocation4 + %s40_s25]]  ;;  %s50_s29 = sadd.s32 4, %s1163_s0 }
  0x17   : > { %s1175_s28 = sld [smem:[#allocation4 + %s45_s27]]  ;;  %s55_s5 = sadd.s32 5, %s1163_s0 }
  0x18   : > { %s1178_s30 = sld [smem:[#allocation4 + %s50_s29]]  ;;  %s60_s6 = sadd.s32 6, %s1163_s0 }
  0x19   : > { %s1182_s7 = sld [smem:[#allocation4 + %s55_s5]]  ;;  %s65_s9 = sadd.s32 7, %s1163_s0 }
  0x1a   : > { %s1184_s8 = sld [smem:[#allocation4 + %s60_s6]]  ;;  %s70_s19 = sadd.s32 8, %s1163_s0 }
  0x1b   : > { %2730 = sst [smem:[#allocation11_spill]] %s1169_s24  ;;  %s75_s10 = sadd.s32 9, %s1163_s0 }
  0x1c   : > { %2731 = sst [smem:[#allocation12_spill]] %s1172_s26  ;;  %s80_s14 = sadd.s32 10, %s1163_s0 }
  0x1d   : > { %2732 = sst [smem:[#allocation13_spill]] %s1175_s28  ;;  %s85_s16 = sadd.s32 11, %s1163_s0 }
  0x1e   : > { %2733 = sst [smem:[#allocation14_spill]] %s1178_s30  ;;  %s95_s18 = sadd.s32 13, %s1163_s0 }
  0x1f   : > { %2734 = sst [smem:[#allocation15_spill]] %s1182_s7  ;;  %s100_s15 = sadd.s32 14, %s1163_s0 }
  0x20   : > { %2735 = sst [smem:[#allocation16_spill]] %s1184_s8  ;;  %s105_s29 = sadd.s32 15, %s1163_s0 }
  0x21   : > { %s1204_s27 = sld [smem:[#allocation4 + %s65_s9]]  ;;  %s1256_s17 = sadd.s32 16, %s1163_s0 }
  0x22   : > { %s1211_s11 = sld [smem:[#allocation4 + %s70_s19]]  ;;  %s90_s19 = sadd.s32 12, %s1163_s0 }
  0x23   : > { %s1213_s13 = sld [smem:[#allocation4 + %s75_s10]]  ;;  %s115_s4 = sadd.s32 1, %s1256_s17 }
  0x24   : > { %s1221_s23 = sld [smem:[#allocation4 + %s80_s14]]  ;;  %s120_s5 = sadd.s32 2, %s1256_s17 }
  0x25   : > { %s1228_s25 = sld [smem:[#allocation4 + %s85_s16]]  ;;  %s130_s12 = sadd.s32 4, %s1256_s17 }
  0x26   : > { %s1230_s10 = sld [smem:[#allocation4 + %s90_s19]]  ;;  %s140_s3 = sadd.s32 6, %s1256_s17 }
  0x27   : > { %2736 = sst [smem:[#allocation17_spill]] %s1204_s27  ;;  %s150_s2 = sadd.s32 8, %s1256_s17 }
  0x28   : > { %2737 = sst [smem:[#allocation18_spill]] %s1211_s11  ;;  %s125_s11 = sadd.s32 3, %s1256_s17 }
  0x29   : > { %2738 = sst [smem:[#allocation19_spill]] %s1213_s13  ;;  %s160_s20 = sadd.s32 10, %s1256_s17 }
  0x2a   : > { %2739 = sst [smem:[#allocation20_spill]] %s1221_s23  ;;  %s170_s13 = sadd.s32 12, %s1256_s17 }
  0x2b   : > { %2740 = sst [smem:[#allocation21_spill]] %s1228_s25 }
  0x2c   : > { %2741 = sst [smem:[#allocation22_spill]] %s1230_s10 }
  0x2d   : > { %s1238_s14 = sld [smem:[#allocation4 + %s95_s18]] }
  0x2e   : > { %s1240_s9 = sld [smem:[#allocation4 + %s100_s15]] }
  0x2f   : > { %s1258_s15 = sld [smem:[#allocation4 + %s105_s29]] }
  0x30   : > { %s1261_s18 = sld [smem:[#allocation4 + %s1256_s17]] }
  0x31   : > { %s1273_s6 = sld [smem:[#allocation4 + %s115_s4]] }
  0x32   : > { %s1275_s29 = sld [smem:[#allocation4 + %s120_s5]]  ;;  %s135_s5 = sadd.s32 5, %s1256_s17 }
  0x33   : > { %2742 = sst [smem:[#allocation23_spill]] %s1238_s14 }
  0x34   : > { %2743 = sst [smem:[#allocation24_spill]] %s1240_s9 }
  0x35   : > { %2744 = sst [smem:[#allocation25_spill]] %s1258_s15 }
  0x36   : > { %s1287_s19 = sld [smem:[#allocation4 + %s125_s11]] }
  0x37   : > { %s1289_s4 = sld [smem:[#allocation4 + %s130_s12]]  ;;  %s145_s12 = sadd.s32 7, %s1256_s17 }
  0x38   : > { %2745 = sst [smem:[#allocation26_spill]] %s1275_s29 }
  0x39   : > { %s1301_s16 = sld [smem:[#allocation4 + %s135_s5]] }
  0x3a   : > { %s1303_s11 = sld [smem:[#allocation4 + %s140_s3]]  ;;  %s155_s3 = sadd.s32 9, %s1256_s17 }
  0x3b   : > { %s1315_s14 = sld [smem:[#allocation4 + %s145_s12]] }
  0x3c   : > { %2746 = sst [smem:[#allocation27_spill]] %s1287_s19 }
  0x3d   : > { %2747 = sst [smem:[#allocation28_spill]] %s1289_s4 }
  0x3e   : > { %s1317_s5 = sld [smem:[#allocation4 + %s150_s2]]  ;;  %s165_s2 = sadd.s32 11, %s1256_s17 }
  0x3f   : > { %2748 = sst [smem:[#allocation29_spill]] %s1301_s16 }
  0x40   : > { %2749 = sst [smem:[#allocation30_spill]] %s1303_s11 }
  0x41   : > { %2750 = sst [smem:[#allocation31_spill]] %s1315_s14 }
  0x42   : > { %s1329_s23 = sld [smem:[#allocation4 + %s155_s3]]  ;;  %s175_s3 = sadd.s32 13, %s1256_s17 }
  0x43   : > { %s1331_s12 = sld [smem:[#allocation4 + %s160_s20]]  ;;  %s180_s20 = sadd.s32 14, %s1256_s17 }
  0x44   : > { %2751 = sst [smem:[#allocation32_spill]] %s1317_s5 }
  0x45   : > { %s1343_s9 = sld [smem:[#allocation4 + %s165_s2]]  ;;  %s185_s2 = sadd.s32 15, %s1256_s17 }
  0x46   : > { %s1345_s10 = sld [smem:[#allocation4 + %s170_s13]]  ;;  %s1363_s13 = sadd.s32 32, %s1163_s0 }
  0x47   : > { %s1357_s25 = sld [smem:[#allocation4 + %s175_s3]]  ;;  %s200_s8 = sadd.s32 2, %s1363_s13 }
  0x48   : > { %2752 = sst [smem:[#allocation33_spill]] %s1329_s23  ;;  %s205_s21 = sadd.s32 3, %s1363_s13 }
  0x49   : > { %2753 = sst [smem:[#allocation34_spill]] %s1331_s12  ;;  %s210_s12 = sadd.s32 4, %s1363_s13 }
  0x4a   : > { %s1359_s15 = sld [smem:[#allocation4 + %s180_s20]]  ;;  %s195_s20 = sadd.s32 1, %s1363_s13 }
  0x4b   : > { %2754 = sst [smem:[#allocation35_spill]] %s1343_s9  ;;  %s220_s26 = sadd.s32 6, %s1363_s13 }
  0x4c   : > { %2755 = sst [smem:[#allocation36_spill]] %s1345_s10  ;;  %s230_s30 = sadd.s32 8, %s1363_s13 }
  0x4d   : > { %2756 = sst [smem:[#allocation37_spill]] %s1357_s25  ;;  %s240_s9 = sadd.s32 10, %s1363_s13 }
  0x4e   : > { %s1373_s3 = sld [smem:[#allocation4 + %s185_s2]]  ;;  %s250_s5 = sadd.s32 12, %s1363_s13 }
  0x4f   : > { %s1376_s17 = sld [smem:[#allocation4 + %s1363_s13]] }
  0x50   : > { %2757 = sst [smem:[#allocation38_spill]] %s1359_s15 }
  0x51   : > { %s1388_s19 = sld [smem:[#allocation4 + %s195_s20]] }
  0x52   : > { %s1390_s2 = sld [smem:[#allocation4 + %s200_s8]]  ;;  %s215_s8 = sadd.s32 5, %s1363_s13 }
  0x53   : > { %s1402_s4 = sld [smem:[#allocation4 + %s205_s21]] }
  0x54   : > { %2758 = sst [smem:[#allocation39_spill]] %s1373_s3 }
  0x55   : > { %s1404_s20 = sld [smem:[#allocation4 + %s210_s12]]  ;;  %s225_s12 = sadd.s32 7, %s1363_s13 }
  0x56   : > { %s1416_s27 = sld [smem:[#allocation4 + %s215_s8]] }
  0x57   : > { %s1418_s21 = sld [smem:[#allocation4 + %s220_s26]]  ;;  %s235_s26 = sadd.s32 9, %s1363_s13 }
  0x58   : > { %2759 = sst [smem:[#allocation40_spill]] %s1390_s2 }
  0x59   : > { %2760 = sst [smem:[#allocation41_spill]] %s1402_s4 }
  0x5a   : > { %s1430_s23 = sld [smem:[#allocation4 + %s225_s12]] }
  0x5b   : > { %2761 = sst [smem:[#allocation42_spill]] %s1404_s20 }
  0x5c   : > { %2762 = sst [smem:[#allocation43_spill]] %s1416_s27  ;;  %s2807_s27 = sld [smem:[#allocation26_spill]] }
  0x5d   : > { %2763 = sst [smem:[#allocation44_spill]] %s1418_s21 }
  0x5e   : > { %s1432_s8 = sld [smem:[#allocation4 + %s230_s30]]  ;;  %s245_s30 = sadd.s32 11, %s1363_s13 }
  0x5f   : > { %s1444_s10 = sld [smem:[#allocation4 + %s235_s26]]  ;;  %s255_s26 = sadd.s32 13, %s1363_s13 }
  0x60   : > { %2764 = sst [smem:[#allocation45_spill]] %s1430_s23 }
  0x61   : > { %s1446_s12 = sld [smem:[#allocation4 + %s240_s9]]  ;;  %s260_s9 = sadd.s32 14, %s1363_s13 }
  0x62   : > { %s1458_s14 = sld [smem:[#allocation4 + %s245_s30]]  ;;  %s265_s30 = sadd.s32 15, %s1363_s13 }
  0x63   : > { %s1460_s15 = sld [smem:[#allocation4 + %s250_s5]]  ;;  %s1478_s5 = sadd.s32 48, %s1163_s0 }
  0x64   : > { %2765 = sst [smem:[#allocation46_spill]] %s1432_s8  ;;  %s280_s11 = sadd.s32 2, %s1478_s5 }
  0x65   : > { %2766 = sst [smem:[#allocation47_spill]] %s1444_s10  ;;  %s285_s28 = sadd.s32 3, %s1478_s5 }
  0x66   : > { %s1472_s25 = sld [smem:[#allocation4 + %s255_s26]]  ;;  %s300_s24 = sadd.s32 6, %s1478_s5 }
  0x67   : > { %2767 = sst [smem:[#allocation48_spill]] %s1446_s12  ;;  %s290_s12 = sadd.s32 4, %s1478_s5 }
  0x68   : > { %2768 = sst [smem:[#allocation49_spill]] %s1458_s14  ;;  %s310_s2 = sadd.s32 8, %s1478_s5 }
  0x69   : > { %2769 = sst [smem:[#allocation50_spill]] %s1460_s15  ;;  %s320_s14 = sadd.s32 10, %s1478_s5 }
  0x6a   : > { %s1474_s3 = sld [smem:[#allocation4 + %s260_s9]]  ;;  %s275_s9 = sadd.s32 1, %s1478_s5 }
  0x6b   : > { %s1488_s26 = sld [smem:[#allocation4 + %s265_s30]]  ;;  %s330_s8 = sadd.s32 12, %s1478_s5 }
  0x6c   : > { %2770 = sst [smem:[#allocation51_spill]] %s1472_s25 }
  0x6d   : > { %s1491_s13 = sld [smem:[#allocation4 + %s1478_s5]] }
  0x6e   : > { %s1503_s29 = sld [smem:[#allocation4 + %s275_s9]] }
  0x6f   : > { %s1505_s30 = sld [smem:[#allocation4 + %s280_s11]]  ;;  %s295_s11 = sadd.s32 5, %s1478_s5 }
  0x70   : > { %2771 = sst [smem:[#allocation52_spill]] %s1474_s3 }
  0x71   : > { %2772 = sst [smem:[#allocation53_spill]] %s1488_s26 }
  0x72   : > { %s1517_s20 = sld [smem:[#allocation4 + %s285_s28]] }
  0x73   : > { %2773 = sst [smem:[#allocation54_spill]] %s1491_s13 }
  0x74   : > { %2774 = sst [smem:[#allocation55_spill]] %s1503_s29 }
  0x75   : > { %2775 = sst [smem:[#allocation56_spill]] %s1505_s30 }
  0x76   : > { %s1519_s9 = sld [smem:[#allocation4 + %s290_s12]]  ;;  %s305_s12 = sadd.s32 7, %s1478_s5 }
  0x77   : > { %s1531_s7 = sld [smem:[#allocation4 + %s295_s11]] }
  0x78   : > { %2776 = sst [smem:[#allocation57_spill]] %s1517_s20  ;;  %s2805_s20 = sld [smem:[#allocation11_spill]] }
  0x79   : > { %s1533_s28 = sld [smem:[#allocation4 + %s300_s24]]  ;;  %s315_s24 = sadd.s32 9, %s1478_s5 }
  0x7a   : > { %s1545_s10 = sld [smem:[#allocation4 + %s305_s12]] }
  0x7b   : > { %s1547_s11 = sld [smem:[#allocation4 + %s310_s2]]  ;;  %s325_s2 = sadd.s32 11, %s1478_s5 }
  0x7c   : > { %2777 = sst [smem:[#allocation58_spill]] %s1519_s9 }
  0x7d   : > { %2778 = sst [smem:[#allocation59_spill]] %s1531_s7  ;;  %s2806_s7 = scalar_lea.vmem %s2633_s1, %s1261_s18 }
  0x7e   : > { %s1559_s15 = sld [smem:[#allocation4 + %s315_s24]]  ;;  %s335_s24 = sadd.s32 13, %s1478_s5  ;;  %v114_v0 = vld [vmem:[%s2806_s7] sm:$0x1] }
  0x7f   : > { %2779 = sst [smem:[#allocation60_spill]] %s1533_s28  ;;  %s2810_s7 = sld [smem:[#allocation55_spill]] }
  0x80   : > { %2780 = sst [smem:[#allocation61_spill]] %s1545_s10 }
  0x81   : > { %2781 = sst [smem:[#allocation62_spill]] %s1547_s11 }
  0x82   : > { %s1561_s12 = sld [smem:[#allocation4 + %s320_s14]]  ;;  %s340_s14 = sadd.s32 14, %s1478_s5 }
  0x83   : > { %s1573_s23 = sld [smem:[#allocation4 + %s325_s2]]  ;;  %s345_s2 = sadd.s32 15, %s1478_s5 }
  0x84   : > { %2782 = sst [smem:[#allocation63_spill]] %s1559_s15 }
  0x85   : > { %s1575_s3 = sld [smem:[#allocation4 + %s330_s8]]  ;;  %s1593_s8 = sadd.s32 64, %s1163_s0 }
  0x86   : > { %s1587_s25 = sld [smem:[#allocation4 + %s335_s24]]  ;;  %s360_s21 = sadd.s32 2, %s1593_s8 }
  0x87   : > { %s1589_s26 = sld [smem:[#allocation4 + %s340_s14]]  ;;  %s355_s14 = sadd.s32 1, %s1593_s8 }
  0x88   : > { %2783 = sst [smem:[#allocation64_spill]] %s1561_s12  ;;  %s365_s4 = sadd.s32 3, %s1593_s8 }
  0x89   : > { %2784 = sst [smem:[#allocation65_spill]] %s1573_s23  ;;  %s370_s12 = sadd.s32 4, %s1593_s8 }
  0x8a   : > { %s1603_s24 = sld [smem:[#allocation4 + %s345_s2]]  ;;  %s380_s13 = sadd.s32 6, %s1593_s8 }
  0x8b   : > { %2785 = sst [smem:[#allocation66_spill]] %s1575_s3  ;;  %s390_s30 = sadd.s32 8, %s1593_s8 }
  0x8c   : > { %2786 = sst [smem:[#allocation67_spill]] %s1587_s25  ;;  %s400_s23 = sadd.s32 10, %s1593_s8 }
  0x8d   : > { %2787 = sst [smem:[#allocation68_spill]] %s1589_s26  ;;  %s410_s11 = sadd.s32 12, %s1593_s8 }
  0x8e   : > { %s1606_s5 = sld [smem:[#allocation4 + %s1593_s8]] }
  0x8f   : > { %s1618_s29 = sld [smem:[#allocation4 + %s355_s14]] }
  0x90   : > { %2788 = sst [smem:[#allocation69_spill]] %s1603_s24 }
  0x91   : > { %s1620_s2 = sld [smem:[#allocation4 + %s360_s21]]  ;;  %s375_s21 = sadd.s32 5, %s1593_s8 }
  0x92   : > { %s1632_s9 = sld [smem:[#allocation4 + %s365_s4]] }
  0x93   : > { %s1634_s14 = sld [smem:[#allocation4 + %s370_s12]]  ;;  %s385_s12 = sadd.s32 7, %s1593_s8 }
  0x94   : > { %2789 = sst [smem:[#allocation70_spill]] %s1606_s5  ;;  %s2823_s5 = scalar_lea.vmem %s2633_s1, %s2810_s7 }
  0x95   : > { %2790 = sst [smem:[#allocation71_spill]] %s1618_s29  ;;  %v278_v10 = vld [vmem:[%s2823_s5] sm:$0x1] }
  0x96   : > { %s1646_s16 = sld [smem:[#allocation4 + %s375_s21]] }
  0x97   : > { %2791 = sst [smem:[#allocation72_spill]] %s1620_s2 }
  0x98   : > { %2792 = sst [smem:[#allocation73_spill]] %s1632_s9  ;;  %s2826_s2 = sld [smem:[#allocation56_spill]] }
  0x99   : > { %2793 = sst [smem:[#allocation74_spill]] %s1634_s14 }
  0x9a   : > { %s1648_s4 = sld [smem:[#allocation4 + %s380_s13]]  ;;  %s395_s13 = sadd.s32 9, %s1593_s8 }
  0x9b   : > { %s1660_s15 = sld [smem:[#allocation4 + %s385_s12]] }
  0x9c   : > { %2794 = sst [smem:[#allocation75_spill]] %s1646_s16 }
  0x9d   : > { %s1662_s21 = sld [smem:[#allocation4 + %s390_s30]]  ;;  %s405_s30 = sadd.s32 11, %s1593_s8 }
  0x9e   : > { %s1674_s3 = sld [smem:[#allocation4 + %s395_s13]]  ;;  %s415_s13 = sadd.s32 13, %s1593_s8 }
  0x9f   : > { %s1676_s12 = sld [smem:[#allocation4 + %s400_s23]]  ;;  %s420_s23 = sadd.s32 14, %s1593_s8 }
  0xa0   : > { %2795 = sst [smem:[#allocation76_spill]] %s1648_s4 }
  0xa1   : > { %2796 = sst [smem:[#allocation77_spill]] %s1660_s15  ;;  %s2809_s15 = sld [smem:[#allocation54_spill]] }
  0xa2   : > { %s1688_s10 = sld [smem:[#allocation4 + %s405_s30]]  ;;  %s425_s30 = sadd.s32 15, %s1593_s8 }
  0xa3   : > { %2797 = sst [smem:[#allocation78_spill]] %s1662_s21  ;;  %s2808_s21 = scalar_lea.vmem %s2633_s1, %s1273_s6 }
  0xa4   : > { %2798 = sst [smem:[#allocation79_spill]] %s1674_s3  ;;  %v118_v1 = vld [vmem:[%s2808_s21] sm:$0x1]  ;;  %s2811_s21 = scalar_lea.vmem %s2633_s1, %s1166_s22 }
  0xa5   : > { %2799 = sst [smem:[#allocation80_spill]] %s1676_s12  ;;  %v34_v2 = vld [vmem:[%s2811_s21] sm:$0x1]  ;;  %v119_v3 = vadd.f32 %v118_v1, %v114_v0  ;;  %s2820_s6 = sld [smem:[#allocation70_spill]] }
  0xa6   : > { %s1690_s26 = sld [smem:[#allocation4 + %s410_s11]]  ;;  %s1708_s11 = sadd.s32 80, %s1163_s0 }
  0xa7   : > { %s1702_s25 = sld [smem:[#allocation4 + %s415_s13]]  ;;  %s440_s28 = sadd.s32 2, %s1708_s11 }
  0xa8   : > { %2800 = sst [smem:[#allocation81_spill]] %s1688_s10  ;;  %s445_s14 = sadd.s32 3, %s1708_s11 }
  0xa9   : > { %s1704_s24 = sld [smem:[#allocation4 + %s420_s23]]  ;;  %s435_s23 = sadd.s32 1, %s1708_s11 }
  0xaa   : > { %s1718_s13 = sld [smem:[#allocation4 + %s425_s30]]  ;;  %s450_s12 = sadd.s32 4, %s1708_s11 }
  0xab   : > { %s1721_s8 = sld [smem:[#allocation4 + %s1708_s11]]  ;;  %s455_s3 = sadd.s32 5, %s1708_s11 }
  0xac   : > { %2801 = sst [smem:[#allocation82_spill]] %s1690_s26  ;;  %s460_s9 = sadd.s32 6, %s1708_s11 }
  0xad   : > { %2802 = sst [smem:[#allocation83_spill]] %s1702_s25  ;;  %s2812_s26 = scalar_lea.vmem %s2633_s1, %s1376_s17 }
  0xae   : > { %s1733_s29 = sld [smem:[#allocation4 + %s435_s23]]  ;;  %v194_v4 = vld [vmem:[%s2812_s26] sm:$0x1]  ;;  %s2815_s17 = scalar_lea.vmem %s2633_s1, %s2805_s20 }
  0xaf   : > { %2803 = sst [smem:[#allocation84_spill]] %s1704_s24  ;;  %s2814_s24 = sld [smem:[#allocation40_spill]]  ;;  %v38_v6 = vld [vmem:[%s2815_s17] sm:$0x1] }
  0xb0   : > { %2804 = sst [smem:[#allocation85_spill]] %s1718_s13  ;;  %s2817_s26 = sld [smem:[#allocation12_spill]]  ;;  %v39_v11 = vadd.f32 %v38_v6, %v34_v2 }
  0xb1   : > { %s1735_s30 = sld [smem:[#allocation4 + %s440_s28]]  ;;  %s465_s23 = sadd.s32 7, %s1708_s11 }
  0xb2   : > { %s1757_s16 = sld [smem:[#allocation4 + %s445_s14]]  ;;  %s2821_s22 = scalar_lea.vmem %s2633_s1, %s2809_s15 }
  0xb3   : > { %s1759_s18 = sld [smem:[#allocation4 + %s450_s12]]  ;;  %s2813_s12 = scalar_lea.vmem %s2633_s1, %s1388_s19  ;;  %v274_v9 = vld [vmem:[%s2821_s22] sm:$0x1] }
  0xb4   : > { %v198_v5 = vld [vmem:[%s2813_s12] sm:$0x1]  ;;  %s2816_s19 = scalar_lea.vmem %s2633_s1, %s2807_s27  ;;  %s2818_s14 = sld [smem:[#allocation27_spill]]  ;;  %v279_v16 = vadd.f32 %v278_v10, %v274_v9 }
  0xb5   : > { %v123_v7 = vld [vmem:[%s2816_s19] sm:$0x1]  ;;  %s1796_s4 = sld [smem:[#allocation4 + %s455_s3]]  ;;  %s470_s12 = sadd.s32 8, %s1708_s11  ;;  %v199_v8 = vadd.f32 %v198_v5, %v194_v4 }
  0xb6   : > { %s1798_s28 = sld [smem:[#allocation4 + %s460_s9]]  ;;  %s437_s10 = scalar_lea.vmem %s2633_s1, %s1733_s29  ;;  %v124_v12 = vadd.f32 %v123_v7, %v119_v3 }
  0xb7   : > { %s2822_s21 = sld [smem:[#allocation71_spill]]  ;;  %s2824_s19 = sld [smem:[#allocation13_spill]]  ;;  %v438_v28 = vld [vmem:[%s437_s10] sm:$0x1] }
  0xb8   : > { %s1816_s25 = sld [smem:[#allocation4 + %s465_s23]]  ;;  %s2827_s20 = scalar_lea.vmem %s2633_s1, %s2814_s24 }
  0xb9   : > { %v203_v13 = vld [vmem:[%s2827_s20] sm:$0x1]  ;;  %s1827_s17 = sld [smem:[#allocation4 + %s470_s12]]  ;;  %s2828_s23 = scalar_lea.vmem %s2633_s1, %s2817_s26 }
  0xba   : > { %v43_v14 = vld [vmem:[%s2828_s23] sm:$0x1]  ;;  %s2829_s13 = scalar_lea.vmem %s2633_s1, %s2818_s14  ;;  %s2831_s24 = sld [smem:[#allocation41_spill]]  ;;  %v204_v20 = vadd.f32 %v203_v13, %v199_v8 }
  0xbb   : > { %v128_v15 = vld [vmem:[%s2829_s13] sm:$0x1]  ;;  %s475_s0 = sadd.s32 9, %s1708_s11  ;;  %s480_s15 = sadd.s32 10, %s1708_s11  ;;  %v44_v22 = vadd.f32 %v43_v14, %v39_v11 }
  0xbc   : > { %2819 = sst [smem:[#allocation11_spill]] %s1798_s28  ;;  %s2832_s22 = scalar_lea.vmem %s2633_s1, %s2820_s6  ;;  %v129_v23 = vadd.f32 %v128_v15, %v124_v12 }
  0xbd   : > { %v354_v17 = vld [vmem:[%s2832_s22] sm:$0x1]  ;;  %s2833_s5 = scalar_lea.vmem %s2633_s1, %s2822_s21  ;;  %s1855_s23 = sld [smem:[#allocation4 + %s475_s0]] }
  0xbe   : > { %2825 = sst [smem:[#allocation26_spill]] %s1816_s25  ;;  %s2830_s25 = sld [smem:[#allocation28_spill]]  ;;  %v358_v18 = vld [vmem:[%s2833_s5] sm:$0x1] }
  0xbf   : > { %s2835_s27 = scalar_lea.vmem %s2633_s1, %s2824_s19  ;;  %s2836_s12 = scalar_lea.vmem %s2633_s1, %s2826_s2  ;;  %v359_v26 = vadd.f32 %v358_v18, %v354_v17 }
  0xc0   : > { %v48_v19 = vld [vmem:[%s2835_s27] sm:$0x1]  ;;  %s2837_s21 = sld [smem:[#allocation72_spill]]  ;;  %s2840_s14 = sld [smem:[#allocation57_spill]] }
  0xc1   : > { %v283_v21 = vld [vmem:[%s2836_s12] sm:$0x1]  ;;  %s1871_s0 = sld [smem:[#allocation4 + %s480_s15]]  ;;  %s2842_s9 = scalar_lea.vmem %s2633_s1, %s2831_s24  ;;  %v49_v33 = vadd.f32 %v48_v19, %v44_v22 }
  0xc2   : > { %v208_v25 = vld [vmem:[%s2842_s9] sm:$0x1]  ;;  %s485_s6 = sadd.s32 11, %s1708_s11  ;;  %s2843_s20 = sld [smem:[#allocation14_spill]]  ;;  %v284_v29 = vadd.f32 %v283_v21, %v279_v16 }
  0xc3   : > { %2834 = sst [smem:[#allocation54_spill]] %s1855_s23  ;;  %s490_s12 = sadd.s32 12, %s1708_s11  ;;  %v209_v31 = vadd.f32 %v208_v25, %v204_v20 }
  0xc4   : > { %s2841_s29 = scalar_lea.vmem %s2633_s1, %s2830_s25  ;;  %s2844_s7 = scalar_lea.vmem %s2633_s1, %s1721_s8 }
  0xc5   : > { %v133_v24 = vld [vmem:[%s2841_s29] sm:$0x1]  ;;  %s2845_s26 = sld [smem:[#allocation42_spill]]  ;;  %s2847_s29 = sld [smem:[#allocation29_spill]] }
  0xc6   : > { %v434_v27 = vld [vmem:[%s2844_s7] sm:$0x1]  ;;  %s1894_s24 = sld [smem:[#allocation4 + %s485_s6]]  ;;  %s2848_s9 = scalar_lea.vmem %s2633_s1, %s2837_s21  ;;  %v134_v35 = vadd.f32 %v133_v24, %v129_v23 }
  0xc7   : > { %2839 = sst [smem:[#allocation55_spill]] %s1871_s0  ;;  %v363_v30 = vld [vmem:[%s2848_s9] sm:$0x1]  ;;  %s2849_s27 = scalar_lea.vmem %s2633_s1, %s2840_s14  ;;  %v439_v37 = vadd.f32 %v438_v28, %v434_v27 }
  0xc8   : > { %v288_v32 = vld [vmem:[%s2849_s27] sm:$0x1]  ;;  %s2850_s13 = sld [smem:[#allocation73_spill]]  ;;  %s495_s21 = sadd.s32 13, %s1708_s11  ;;  %v364_v39 = vadd.f32 %v363_v30, %v359_v26 }
  0xc9   : > { %s1914_s3 = sld [smem:[#allocation4 + %s490_s12]]  ;;  %s2853_s8 = scalar_lea.vmem %s2633_s1, %s2843_s20  ;;  %v289_v41 = vadd.f32 %v288_v32, %v284_v29 }
  0xca   : > { %s2852_s2 = sld [smem:[#allocation10_spill]]  ;;  %v53_v34 = vld [vmem:[%s2853_s8] sm:$0x1]  ;;  %s2856_s25 = sld [smem:[#allocation15_spill]] }
  0xcb   : > { %s2854_s22 = sld [smem:[#allocation58_spill]]  ;;  %s2855_s6 = scalar_lea.vmem %s2633_s1, %s2845_s26  ;;  %v54_v45 = vadd.f32 %v53_v34, %v49_v33 }
  0xcc   : > { %2846 = sst [smem:[#allocation40_spill]] %s1894_s24  ;;  %v213_v36 = vld [vmem:[%s2855_s6] sm:$0x1]  ;;  %s500_s10 = sadd.s32 14, %s1708_s11 }
  0xcd   : > { %s2857_s20 = scalar_lea.vmem %s2633_s1, %s2847_s29  ;;  %s2858_s9 = sld [smem:[#allocation43_spill]]  ;;  %v214_v43 = vadd.f32 %v213_v36, %v209_v31 }
  0xce   : > { %v138_v38 = vld [vmem:[%s2857_s20] sm:$0x1]  ;;  %s2859_s26 = scalar_lea.vmem %s2633_s1, %s1735_s30  ;;  %s1946_s14 = sld [smem:[#allocation4 + %s495_s21]] }
  0xcf   : > { %2851 = sst [smem:[#allocation12_spill]] %s1914_s3  ;;  %v443_v40 = vld [vmem:[%s2859_s26] sm:$0x1]  ;;  %s2860_s12 = sld [smem:[#allocation30_spill]]  ;;  %v139_v47 = vadd.f32 %v138_v38, %v134_v35 }
  0xd0   : > { %s2861_s5 = scalar_lea.vmem %s2633_s1, %s2850_s13  ;;  %s1958_s15 = sadd.s32 96, %s2852_s2  ;;  %v444_v49 = vadd.f32 %v443_v40, %v439_v37 }
  0xd1   : > { %v368_v42 = vld [vmem:[%s2861_s5] sm:$0x1]  ;;  %s2862_s26 = scalar_lea.vmem %s2633_s1, %s2854_s22  ;;  %s2863_s19 = sld [smem:[#allocation74_spill]] }
  0xd2   : > { %v293_v44 = vld [vmem:[%s2862_s26] sm:$0x1]  ;;  %s1965_s27 = sld [smem:[#allocation4 + %s500_s10]]  ;;  %s505_s13 = sadd.s32 15, %s1708_s11  ;;  %v369_v51 = vadd.f32 %v368_v42, %v364_v39 }
  0xd3   : > { %s2864_s5 = scalar_lea.vmem %s2633_s1, %s2856_s25  ;;  %s2865_s29 = sld [smem:[#allocation59_spill]]  ;;  %v294_v53 = vadd.f32 %v293_v44, %v289_v41 }
  0xd4   : > { %v58_v46 = vld [vmem:[%s2864_s5] sm:$0x1]  ;;  %s2866_s6 = scalar_lea.vmem %s2633_s1, %s2858_s9  ;;  %s2867_s11 = sld [smem:[#allocation16_spill]] }
  0xd5   : > { %v218_v48 = vld [vmem:[%s2866_s6] sm:$0x1]  ;;  %s1983_s8 = sld [smem:[#allocation4 + %s1958_s15]]  ;;  %s2868_s25 = scalar_lea.vmem %s2633_s1, %s2860_s12  ;;  %v59_v57 = vadd.f32 %v58_v46, %v54_v45 }
  0xd6   : > { %v143_v50 = vld [vmem:[%s2868_s25] sm:$0x1]  ;;  %s2869_s28 = sld [smem:[#allocation44_spill]]  ;;  %s2870_s9 = scalar_lea.vmem %s2633_s1, %s1757_s16  ;;  %v219_v55 = vadd.f32 %v218_v48, %v214_v43 }
  0xd7   : > { %v448_v52 = vld [vmem:[%s2870_s9] sm:$0x1]  ;;  %s515_s6 = sadd.s32 1, %s1958_s15  ;;  %s520_s20 = sadd.s32 2, %s1958_s15  ;;  %v144_v59 = vadd.f32 %v143_v50, %v139_v47 }
  0xd8   : > { %s2871_s22 = sld [smem:[#allocation31_spill]]  ;;  %s2872_s24 = scalar_lea.vmem %s2633_s1, %s2863_s19  ;;  %v449_v61 = vadd.f32 %v448_v52, %v444_v49 }
  0xd9   : > { %v373_v54 = vld [vmem:[%s2872_s24] sm:$0x1]  ;;  %s2002_s12 = sld [smem:[#allocation4 + %s505_s13]]  ;;  %s2874_s25 = scalar_lea.vmem %s2633_s1, %s2865_s29 }
  0xda   : > { %s2004_s26 = sld [smem:[#allocation4 + %s515_s6]]  ;;  %v298_v56 = vld [vmem:[%s2874_s25] sm:$0x1]  ;;  %s2876_s10 = scalar_lea.vmem %s2633_s1, %s2867_s11  ;;  %v374_v63 = vadd.f32 %v373_v54, %v369_v51 }
  0xdb   : > { %s2875_s9 = sld [smem:[#allocation75_spill]]  ;;  %s2877_s6 = sld [smem:[#allocation17_spill]]  ;;  %v63_v58 = vld [vmem:[%s2876_s10] sm:$0x1]  ;;  %v299_v1 = vadd.f32 %v298_v56, %v294_v53 }
  0xdc   : > { %s2015_s19 = sld [smem:[#allocation4 + %s520_s20]]  ;;  %s2878_s29 = scalar_lea.vmem %s2633_s1, %s2869_s28  ;;  %v64_v7 = vadd.f32 %v63_v58, %v59_v57 }
  0xdd   : > { %s2879_s7 = sld [smem:[#allocation60_spill]]  ;;  %v223_v60 = vld [vmem:[%s2878_s29] sm:$0x1]  ;;  %s525_s25 = sadd.s32 3, %s1958_s15 }
  0xde   : > { %s530_s20 = sadd.s32 4, %s1958_s15  ;;  %s2880_s0 = scalar_lea.vmem %s2633_s1, %s2871_s22  ;;  %v224_v4 = vadd.f32 %v223_v60, %v219_v55 }
  0xdf   : > { %2873 = sst [smem:[#allocation27_spill]] %s2002_s12  ;;  %v148_v62 = vld [vmem:[%s2880_s0] sm:$0x1]  ;;  %s2881_s13 = scalar_lea.vmem %s2633_s1, %s1759_s18 }
  0xe0   : > { %s2882_s10 = sld [smem:[#allocation32_spill]]  ;;  %v453_v0 = vld [vmem:[%s2881_s13] sm:$0x1]  ;;  %s2883_s16 = sld [smem:[#allocation45_spill]]  ;;  %v149_v8 = vadd.f32 %v148_v62, %v144_v59 }
  0xe1   : > { %s2043_s3 = sld [smem:[#allocation4 + %s525_s25]]  ;;  %s2884_s0 = scalar_lea.vmem %s2633_s1, %s2875_s9  ;;  %v454_v11 = vadd.f32 %v453_v0, %v449_v61 }
  0xe2   : > { %v378_v2 = vld [vmem:[%s2884_s0] sm:$0x1]  ;;  %s513_s18 = scalar_lea.vmem %s2633_s1, %s1983_s8  ;;  %s2054_s11 = sld [smem:[#allocation4 + %s530_s20]] }
  0xe3   : > { %s2885_s28 = scalar_lea.vmem %s2633_s1, %s2877_s6  ;;  %s2886_s23 = scalar_lea.vmem %s2633_s1, %s2879_s7  ;;  %v514_v6 = vld [vmem:[%s513_s18] sm:$0x1]  ;;  %v379_v12 = vadd.f32 %v378_v2, %v374_v63 }
  0xe4   : > { %v68_v3 = vld [vmem:[%s2885_s28] sm:$0x1]  ;;  %s2887_s9 = sld [smem:[#allocation76_spill]]  ;;  %s535_s5 = sadd.s32 5, %s1958_s15 }
  0xe5   : > { %v303_v5 = vld [vmem:[%s2886_s23] sm:$0x1]  ;;  %s540_s0 = sadd.s32 6, %s1958_s15  ;;  %s2890_s13 = sld [smem:[#allocation18_spill]]  ;;  %v69_v23 = vadd.f32 %v68_v3, %v64_v7 }
  0xe6   : > { %s2888_s22 = scalar_lea.vmem %s2633_s1, %s2882_s10  ;;  %s2889_s24 = scalar_lea.vmem %s2633_s1, %s2883_s16  ;;  %v304_v15 = vadd.f32 %v303_v5, %v299_v1 }
  0xe7   : > { %v153_v9 = vld [vmem:[%s2888_s22] sm:$0x1]  ;;  %s2891_s7 = sld [smem:[#allocation33_spill]]  ;;  %s517_s25 = scalar_lea.vmem %s2633_s1, %s2004_s26 }
  0xe8   : > { %v228_v10 = vld [vmem:[%s2889_s24] sm:$0x1]  ;;  %s2892_s21 = sld [smem:[#allocation61_spill]]  ;;  %s2893_s20 = scalar_lea.vmem %s2633_s1, %s1796_s4  ;;  %v154_v24 = vadd.f32 %v153_v9, %v149_v8 }
  0xe9   : > { %s2082_s23 = sld [smem:[#allocation4 + %s535_s5]]  ;;  %v458_v13 = vld [vmem:[%s2893_s20] sm:$0x1]  ;;  %s522_s6 = scalar_lea.vmem %s2633_s1, %s2015_s19  ;;  %v229_v21 = vadd.f32 %v228_v10, %v224_v4 }
  0xea   : > { %v518_v14 = vld [vmem:[%s517_s25] sm:$0x1]  ;;  %s2894_s30 = sld [smem:[#allocation46_spill]]  ;;  %s2895_s5 = scalar_lea.vmem %s2633_s1, %s2887_s9  ;;  %v459_v26 = vadd.f32 %v458_v13, %v454_v11 }
  0xeb   : > { %s2093_s24 = sld [smem:[#allocation4 + %s540_s0]]  ;;  %v383_v16 = vld [vmem:[%s2895_s5] sm:$0x1]  ;;  %v519_v17 = vadd.f32 %v518_v14, %v514_v6  ;;  %s545_s28 = sadd.s32 7, %s1958_s15 }
  0xec   : > { %v523_v18 = vld [vmem:[%s522_s6] sm:$0x1]  ;;  %s550_s4 = sadd.s32 8, %s1958_s15  ;;  %s2896_s8 = scalar_lea.vmem %s2633_s1, %s2890_s13  ;;  %v384_v29 = vadd.f32 %v383_v16, %v379_v12 }
  0xed   : > { %s2897_s20 = sld [smem:[#allocation11_spill]]  ;;  %v73_v19 = vld [vmem:[%s2896_s8] sm:$0x1]  ;;  %s2898_s16 = scalar_lea.vmem %s2633_s1, %s2891_s7  ;;  %v524_v27 = vadd.f32 %v523_v18, %v519_v17 }
  0xee   : > { %v158_v20 = vld [vmem:[%s2898_s16] sm:$0x1]  ;;  %s2899_s26 = scalar_lea.vmem %s2633_s1, %s2892_s21  ;;  %s527_s5 = scalar_lea.vmem %s2633_s1, %s2043_s3  ;;  %v74_v39 = vadd.f32 %v73_v19, %v69_v23 }
  0xef   : > { %v308_v22 = vld [vmem:[%s2899_s26] sm:$0x1]  ;;  %s2900_s13 = sld [smem:[#allocation77_spill]]  ;;  %s2902_s19 = sld [smem:[#allocation19_spill]]  ;;  %v159_v40 = vadd.f32 %v158_v20, %v154_v24 }
  0xf0   : > { %s2121_s10 = sld [smem:[#allocation4 + %s545_s28]]  ;;  %s2901_s8 = scalar_lea.vmem %s2633_s1, %s2894_s30  ;;  %v528_v28 = vld [vmem:[%s527_s5] sm:$0x1]  ;;  %v309_v32 = vadd.f32 %v308_v22, %v304_v15 }
  0xf1   : > { %v233_v25 = vld [vmem:[%s2901_s8] sm:$0x1]  ;;  %s2903_s21 = sld [smem:[#allocation62_spill]]  ;;  %s532_s3 = scalar_lea.vmem %s2633_s1, %s2054_s11  ;;  %v529_v34 = vadd.f32 %v528_v28, %v524_v27 }
  0xf2   : > { %s2132_s28 = sld [smem:[#allocation4 + %s550_s4]]  ;;  %v533_v31 = vld [vmem:[%s532_s3] sm:$0x1]  ;;  %s555_s6 = sadd.s32 9, %s1958_s15  ;;  %v234_v36 = vadd.f32 %v233_v25, %v229_v21 }
  0xf3   : > { %s2904_s26 = scalar_lea.vmem %s2633_s1, %s2897_s20  ;;  %s2905_s30 = sld [smem:[#allocation34_spill]]  ;;  %v534_v44 = vadd.f32 %v533_v31, %v529_v34 }
  0xf4   : > { %v463_v30 = vld [vmem:[%s2904_s26] sm:$0x1]  ;;  %s2906_s18 = sld [smem:[#allocation47_spill]]  ;;  %s560_s7 = sadd.s32 10, %s1958_s15 }
  0xf5   : > { %s2907_s8 = scalar_lea.vmem %s2633_s1, %s2900_s13  ;;  %s537_s0 = scalar_lea.vmem %s2633_s1, %s2082_s23  ;;  %v464_v43 = vadd.f32 %v463_v30, %v459_v26 }
  0xf6   : > { %v388_v33 = vld [vmem:[%s2907_s8] sm:$0x1]  ;;  %s2150_s20 = sld [smem:[#allocation4 + %s555_s6]]  ;;  %s2908_s9 = scalar_lea.vmem %s2633_s1, %s2902_s19 }
  0xf7   : > { %s2909_s22 = sld [smem:[#allocation26_spill]]  ;;  %v78_v35 = vld [vmem:[%s2908_s9] sm:$0x1]  ;;  %s2910_s13 = scalar_lea.vmem %s2633_s1, %s2903_s21  ;;  %v389_v45 = vadd.f32 %v388_v33, %v384_v29 }
  0xf8   : > { %v313_v37 = vld [vmem:[%s2910_s13] sm:$0x1]  ;;  %s542_s23 = scalar_lea.vmem %s2633_s1, %s2093_s24  ;;  %s2911_s6 = sld [smem:[#allocation78_spill]]  ;;  %v79_v54 = vadd.f32 %v78_v35, %v74_v39 }
  0xf9   : > { %v538_v38 = vld [vmem:[%s537_s0] sm:$0x1]  ;;  %s2166_s11 = sld [smem:[#allocation4 + %s560_s7]]  ;;  %s2912_s16 = scalar_lea.vmem %s2633_s1, %s2905_s30  ;;  %v314_v48 = vadd.f32 %v313_v37, %v309_v32 }
  0xfa   : > { %v163_v41 = vld [vmem:[%s2912_s16] sm:$0x1]  ;;  %s2913_s0 = scalar_lea.vmem %s2633_s1, %s2906_s18  ;;  %s2914_s9 = sld [smem:[#allocation20_spill]]  ;;  %v539_v50 = vadd.f32 %v538_v38, %v534_v44 }
  0xfb   : > { %v238_v42 = vld [vmem:[%s2913_s0] sm:$0x1]  ;;  %s2915_s24 = sld [smem:[#allocation63_spill]]  ;;  %s565_s7 = sadd.s32 11, %s1958_s15  ;;  %v164_v55 = vadd.f32 %v163_v41, %v159_v40 }
  0xfc   : > { %s570_s26 = sadd.s32 12, %s1958_s15  ;;  %s2917_s30 = sld [smem:[#allocation48_spill]]  ;;  %v543_v47 = vld [vmem:[%s542_s23] sm:$0x1]  ;;  %v239_v52 = vadd.f32 %v238_v42, %v234_v36 }
  0xfd   : > { %s2916_s25 = scalar_lea.vmem %s2633_s1, %s2909_s22  ;;  %s547_s18 = scalar_lea.vmem %s2633_s1, %s2121_s10  ;;  %v544_v58 = vadd.f32 %v543_v47, %v539_v50 }
  0xfe   : > { %v468_v46 = vld [vmem:[%s2916_s25] sm:$0x1]  ;;  %s2189_s4 = sld [smem:[#allocation4 + %s565_s7]]  ;;  %s2918_s3 = scalar_lea.vmem %s2633_s1, %s2911_s6 }
  0xff   : > { %v393_v49 = vld [vmem:[%s2918_s3] sm:$0x1]  ;;  %s2919_s13 = sld [smem:[#allocation35_spill]]  ;;  %s2922_s21 = sld [smem:[#allocation79_spill]]  ;;  %v469_v57 = vadd.f32 %v468_v46, %v464_v43 }
 0x100   : > { %s2920_s8 = scalar_lea.vmem %s2633_s1, %s2914_s9  ;;  %s2214_s16 = sld [smem:[#allocation4 + %s570_s26]]  ;;  %v548_v59 = vld [vmem:[%s547_s18] sm:$0x1]  ;;  %v394_v61 = vadd.f32 %v393_v49, %v389_v45 }
 0x101   : > { %v83_v51 = vld [vmem:[%s2920_s8] sm:$0x1]  ;;  %s2921_s29 = scalar_lea.vmem %s2633_s1, %s2915_s24  ;;  %s575_s3 = sadd.s32 13, %s1958_s15  ;;  %v549_v4 = vadd.f32 %v548_v59, %v544_v58 }
 0x102   : > { %v318_v53 = vld [vmem:[%s2921_s29] sm:$0x1]  ;;  %s2923_s9 = scalar_lea.vmem %s2633_s1, %s2917_s30  ;;  %s2924_s23 = sld [smem:[#allocation21_spill]]  ;;  %v84_v5 = vadd.f32 %v83_v51, %v79_v54 }
 0x103   : > { %v243_v56 = vld [vmem:[%s2923_s9] sm:$0x1]  ;;  %s2925_s10 = sld [smem:[#allocation64_spill]]  ;;  %s552_s26 = scalar_lea.vmem %s2633_s1, %s2132_s28  ;;  %v319_v63 = vadd.f32 %v318_v53, %v314_v48 }
 0x104   : > { %s580_s8 = sadd.s32 14, %s1958_s15  ;;  %s2927_s5 = scalar_lea.vmem %s2633_s1, %s1827_s17  ;;  %v244_v2 = vadd.f32 %v243_v56, %v239_v52  ;;  %v553_v9 = vld [vmem:[%s552_s26] sm:$0x1] }
 0x105   : > { %s2926_s29 = scalar_lea.vmem %s2633_s1, %s2919_s13  ;;  %s2928_s9 = sld [smem:[#allocation49_spill]]  ;;  %v473_v62 = vld [vmem:[%s2927_s5] sm:$0x1]  ;;  %v554_v18 = vadd.f32 %v553_v9, %v549_v4 }
 0x106   : > { %v168_v60 = vld [vmem:[%s2926_s29] sm:$0x1]  ;;  %s2241_s24 = sld [smem:[#allocation4 + %s575_s3]]  ;;  %s2929_s13 = scalar_lea.vmem %s2633_s1, %s2922_s21  ;;  %v474_v8 = vadd.f32 %v473_v62, %v469_v57 }
 0x107   : > { %v398_v0 = vld [vmem:[%s2929_s13] sm:$0x1]  ;;  %s2930_s29 = sld [smem:[#allocation36_spill]]  ;;  %s2253_s0 = sadd.s32 112, %s2852_s2  ;;  %v169_v6 = vadd.f32 %v168_v60, %v164_v55 }
 0x108   : > { %s2931_s25 = scalar_lea.vmem %s2633_s1, %s2924_s23  ;;  %s2932_s3 = sld [smem:[#allocation54_spill]]  ;;  %v399_v11 = vadd.f32 %v398_v0, %v394_v61 }
 0x109   : > { %v88_v1 = vld [vmem:[%s2931_s25] sm:$0x1]  ;;  %s2933_s21 = scalar_lea.vmem %s2633_s1, %s2925_s10  ;;  %s2934_s7 = sld [smem:[#allocation80_spill]] }
 0x10a   : > { %v323_v3 = vld [vmem:[%s2933_s21] sm:$0x1]  ;;  %s2265_s13 = sld [smem:[#allocation4 + %s580_s8]]  ;;  %s585_s2 = sadd.s32 15, %s1958_s15  ;;  %v89_v19 = vadd.f32 %v88_v1, %v84_v5 }
 0x10b   : > { %s2936_s6 = sld [smem:[#allocation22_spill]]  ;;  %s2937_s30 = scalar_lea.vmem %s2633_s1, %s2928_s9  ;;  %v324_v13 = vadd.f32 %v323_v3, %v319_v63 }
 0x10c   : > { %v248_v7 = vld [vmem:[%s2937_s30] sm:$0x1]  ;;  %s2938_s5 = sld [smem:[#allocation65_spill]]  ;;  %s2941_s19 = sld [smem:[#allocation50_spill]] }
 0x10d   : > { %s2278_s28 = sld [smem:[#allocation4 + %s2253_s0]]  ;;  %s2939_s21 = scalar_lea.vmem %s2633_s1, %s2930_s29  ;;  %v249_v16 = vadd.f32 %v248_v7, %v244_v2 }
 0x10e   : > { %v173_v10 = vld [vmem:[%s2939_s21] sm:$0x1]  ;;  %s2940_s9 = scalar_lea.vmem %s2633_s1, %s2932_s3  ;;  %s595_s26 = sadd.s32 1, %s2253_s0 }
 0x10f   : > { %v478_v12 = vld [vmem:[%s2940_s9] sm:$0x1]  ;;  %s600_s30 = sadd.s32 2, %s2253_s0  ;;  %s2942_s18 = scalar_lea.vmem %s2633_s1, %s2934_s7  ;;  %v174_v20 = vadd.f32 %v173_v10, %v169_v6 }
 0x110   : > { %2935 = sst [smem:[#allocation70_spill]] %s2265_s13  ;;  %v403_v14 = vld [vmem:[%s2942_s18] sm:$0x1]  ;;  %s2943_s29 = sld [smem:[#allocation37_spill]]  ;;  %v479_v22 = vadd.f32 %v478_v12, %v474_v8 }
 0x111   : > { %s2297_s8 = sld [smem:[#allocation4 + %s585_s2]]  ;;  %s2945_s21 = scalar_lea.vmem %s2633_s1, %s2936_s6  ;;  %v404_v25 = vadd.f32 %v403_v14, %v399_v11 }
 0x112   : > { %s2299_s15 = sld [smem:[#allocation4 + %s595_s26]]  ;;  %v93_v15 = vld [vmem:[%s2945_s21] sm:$0x1]  ;;  %s2947_s25 = scalar_lea.vmem %s2633_s1, %s2938_s5 }
 0x113   : > { %s2946_s23 = sld [smem:[#allocation55_spill]]  ;;  %v328_v17 = vld [vmem:[%s2947_s25] sm:$0x1]  ;;  %s2948_s2 = sld [smem:[#allocation81_spill]]  ;;  %v94_v35 = vadd.f32 %v93_v15, %v89_v19 }
 0x114   : > { %s2315_s10 = sld [smem:[#allocation4 + %s600_s30]]  ;;  %s2950_s21 = scalar_lea.vmem %s2633_s1, %s2941_s19  ;;  %v329_v27 = vadd.f32 %v328_v17, %v324_v13 }
 0x115   : > { %s2949_s6 = sld [smem:[#allocation23_spill]]  ;;  %v253_v21 = vld [vmem:[%s2950_s21] sm:$0x1]  ;;  %s2952_s9 = scalar_lea.vmem %s2633_s1, %s2150_s20 }
 0x116   : > { %s2953_s25 = sld [smem:[#allocation66_spill]]  ;;  %v558_v23 = vld [vmem:[%s2952_s9] sm:$0x1]  ;;  %s605_s7 = sadd.s32 3, %s2253_s0  ;;  %v254_v31 = vadd.f32 %v253_v21, %v249_v16 }
 0x117   : > { %2944 = sst [smem:[#allocation71_spill]] %s2297_s8  ;;  %s2951_s8 = sld [smem:[#allocation38_spill]]  ;;  %v559_v33 = vadd.f32 %v558_v23, %v554_v18 }
 0x118   : > { %s610_s18 = sadd.s32 4, %s2253_s0  ;;  %s2954_s12 = scalar_lea.vmem %s2633_s1, %s2943_s29 }
 0x119   : > { %v178_v24 = vld [vmem:[%s2954_s12] sm:$0x1]  ;;  %s2955_s3 = scalar_lea.vmem %s2633_s1, %s2946_s23  ;;  %s2956_s5 = sld [smem:[#allocation51_spill]] }
 0x11a   : > { %v483_v26 = vld [vmem:[%s2955_s3] sm:$0x1]  ;;  %s2343_s9 = sld [smem:[#allocation4 + %s605_s7]]  ;;  %s2957_s29 = scalar_lea.vmem %s2633_s1, %s2948_s2  ;;  %v179_v36 = vadd.f32 %v178_v24, %v174_v20 }
 0x11b   : > { %v408_v28 = vld [vmem:[%s2957_s29] sm:$0x1]  ;;  %s593_s23 = scalar_lea.vmem %s2633_s1, %s2278_s28  ;;  %s2354_s19 = sld [smem:[#allocation4 + %s610_s18]]  ;;  %v484_v38 = vadd.f32 %v483_v26, %v479_v22 }
 0x11c   : > { %s2958_s21 = scalar_lea.vmem %s2633_s1, %s2949_s6  ;;  %s2960_s13 = sld [smem:[#allocation40_spill]]  ;;  %v594_v34 = vld [vmem:[%s593_s23] sm:$0x1]  ;;  %v409_v40 = vadd.f32 %v408_v28, %v404_v25 }
 0x11d   : > { %v98_v29 = vld [vmem:[%s2958_s21] sm:$0x1]  ;;  %s2959_s20 = scalar_lea.vmem %s2633_s1, %s2951_s8  ;;  %s2961_s29 = scalar_lea.vmem %s2633_s1, %s2953_s25 }
 0x11e   : > { %v183_v30 = vld [vmem:[%s2959_s20] sm:$0x1]  ;;  %s2962_s28 = sld [smem:[#allocation82_spill]]  ;;  %s615_s18 = sadd.s32 5, %s2253_s0  ;;  %v99_v53 = vadd.f32 %v98_v29, %v94_v35 }
 0x11f   : > { %v333_v32 = vld [vmem:[%s2961_s29] sm:$0x1]  ;;  %s620_s12 = sadd.s32 6, %s2253_s0  ;;  %s2963_s8 = scalar_lea.vmem %s2633_s1, %s2956_s5  ;;  %v184_v54 = vadd.f32 %v183_v30, %v179_v36 }
 0x120   : > { %v258_v37 = vld [vmem:[%s2963_s8] sm:$0x1]  ;;  %s2964_s20 = sld [smem:[#allocation24_spill]]  ;;  %s2965_s3 = scalar_lea.vmem %s2633_s1, %s2166_s11  ;;  %v334_v43 = vadd.f32 %v333_v32, %v329_v27 }
 0x121   : > { %s2966_s21 = sld [smem:[#allocation39_spill]]  ;;  %v563_v39 = vld [vmem:[%s2965_s3] sm:$0x1]  ;;  %s597_s22 = scalar_lea.vmem %s2633_s1, %s2299_s15  ;;  %v259_v49 = vadd.f32 %v258_v37, %v254_v31 }
 0x122   : > { %s2967_s2 = sld [smem:[#allocation52_spill]]  ;;  %s2968_s29 = sld [smem:[#allocation67_spill]]  ;;  %v598_v42 = vld [vmem:[%s597_s22] sm:$0x1]  ;;  %v564_v52 = vadd.f32 %v563_v39, %v559_v33 }
 0x123   : > { %s2387_s26 = sld [smem:[#allocation4 + %s615_s18]]  ;;  %s2969_s30 = scalar_lea.vmem %s2633_s1, %s2960_s13  ;;  %v599_v45 = vadd.f32 %v598_v42, %v594_v34 }
 0x124   : > { %v488_v41 = vld [vmem:[%s2969_s30] sm:$0x1]  ;;  %s602_s17 = scalar_lea.vmem %s2633_s1, %s2315_s10  ;;  %s2398_s25 = sld [smem:[#allocation4 + %s620_s12]] }
 0x125   : > { %s2970_s18 = scalar_lea.vmem %s2633_s1, %s2962_s28  ;;  %v603_v46 = vld [vmem:[%s602_s17] sm:$0x1]  ;;  %s625_s23 = sadd.s32 7, %s2253_s0  ;;  %v489_v55 = vadd.f32 %v488_v41, %v484_v38 }
 0x126   : > { %v413_v44 = vld [vmem:[%s2970_s18] sm:$0x1]  ;;  %s630_s13 = sadd.s32 8, %s2253_s0  ;;  %s2971_s5 = scalar_lea.vmem %s2633_s1, %s2964_s20  ;;  %v604_v57 = vadd.f32 %v603_v46, %v599_v45 }
 0x127   : > { %v103_v47 = vld [vmem:[%s2971_s5] sm:$0x1]  ;;  %s2972_s6 = scalar_lea.vmem %s2633_s1, %s2966_s21  ;;  %s2973_s30 = sld [smem:[#allocation12_spill]]  ;;  %v414_v59 = vadd.f32 %v413_v44, %v409_v40 }
 0x128   : > { %v188_v48 = vld [vmem:[%s2972_s6] sm:$0x1]  ;;  %s2974_s11 = scalar_lea.vmem %s2633_s1, %s2967_s2  ;;  %s2975_s3 = scalar_lea.vmem %s2633_s1, %s2968_s29  ;;  %v104_v6 = vadd.f32 %v103_v47, %v99_v53 }
 0x129   : > { %v263_v50 = vld [vmem:[%s2974_s11] sm:$0x1]  ;;  %s607_s21 = scalar_lea.vmem %s2633_s1, %s2343_s9  ;;  %s2976_s7 = sld [smem:[#allocation83_spill]]  ;;  %v189_v7 = vadd.f32 %v188_v48, %v184_v54 }
 0x12a   : > { %v338_v51 = vld [vmem:[%s2975_s3] sm:$0x1]  ;;  %s2431_s22 = sld [smem:[#allocation4 + %s625_s23]]  ;;  %s2977_s10 = scalar_lea.vmem %s2633_s1, %s2189_s4  ;;  %v264_v2 = vadd.f32 %v263_v50, %v259_v49 }
 0x12b   : > { %s2978_s29 = sld [smem:[#allocation25_spill]]  ;;  %v568_v56 = vld [vmem:[%s2977_s10] sm:$0x1]  ;;  %s2979_s12 = sld [smem:[#allocation68_spill]]  ;;  %v339_v62 = vadd.f32 %v338_v51, %v334_v43  ;;  %v671_v26 = vrot.slane %v189_v7, 7 }
 0x12c   : > { %v608_v58 = vld [vmem:[%s607_s21] sm:$0x1]  ;;  %s612_s9 = scalar_lea.vmem %s2633_s1, %s2354_s19  ;;  %s2442_s8 = sld [smem:[#allocation4 + %s630_s13]]  ;;  %v569_v4 = vadd.f32 %v568_v56, %v564_v52 }
 0x12d   : > { %s2980_s17 = scalar_lea.vmem %s2633_s1, %s2973_s30  ;;  %v613_v61 = vld [vmem:[%s612_s9] sm:$0x1]  ;;  %s635_s4 = sadd.s32 9, %s2253_s0  ;;  %v609_v0 = vadd.f32 %v608_v58, %v604_v57 }
 0x12e   : > { %v493_v60 = vld [vmem:[%s2980_s17] sm:$0x1]  ;;  %s2981_s15 = sld [smem:[#allocation53_spill]]  ;;  %s640_s3 = sadd.s32 10, %s2253_s0 }
 0x12f   : > { %s2982_s21 = scalar_lea.vmem %s2633_s1, %s2976_s7  ;;  %s617_s2 = scalar_lea.vmem %s2633_s1, %s2387_s26  ;;  %v494_v9 = vadd.f32 %v493_v60, %v489_v55  ;;  %v614_v11 = vadd.f32 %v613_v61, %v609_v0 }
 0x130   : > { %v418_v63 = vld [vmem:[%s2982_s21] sm:$0x1]  ;;  %s2460_s30 = sld [smem:[#allocation4 + %s635_s4]]  ;;  %s622_s11 = scalar_lea.vmem %s2633_s1, %s2398_s25 }
 0x131   : > { %s2983_s6 = scalar_lea.vmem %s2633_s1, %s2978_s29  ;;  %s2984_s9 = scalar_lea.vmem %s2633_s1, %s2979_s12  ;;  %v618_v5 = vld [vmem:[%s617_s2] sm:$0x1]  ;;  %v419_v12 = vadd.f32 %v418_v63, %v414_v59 }
 0x132   : > { %v108_v1 = vld [vmem:[%s2983_s6] sm:$0x1]  ;;  %s2985_s17 = sld [smem:[#allocation84_spill]]  ;;  %s2987_s19 = scalar_lea.vmem %s2633_s1, %s2214_s16  ;;  %v619_v17 = vadd.f32 %v618_v5, %v614_v11 }
 0x133   : > { %v343_v3 = vld [vmem:[%s2984_s9] sm:$0x1]  ;;  %s2476_s4 = sld [smem:[#allocation4 + %s640_s3]]  ;;  %s645_s25 = sadd.s32 11, %s2253_s0  ;;  %v109_v22 = vadd.f32 %v108_v1, %v104_v6 }
 0x134   : > { %s2986_s18 = scalar_lea.vmem %s2633_s1, %s2981_s15  ;;  %s2988_s13 = sld [smem:[#allocation69_spill]]  ;;  %v573_v10 = vld [vmem:[%s2987_s19] sm:$0x1]  ;;  %v344_v15 = vadd.f32 %v343_v3, %v339_v62 }
 0x135   : > { %v268_v8 = vld [vmem:[%s2986_s18] sm:$0x1]  ;;  %s650_s3 = sadd.s32 12, %s2253_s0  ;;  %s2989_s10 = scalar_lea.vmem %s2633_s1, %s1946_s14  ;;  %v574_v20 = vadd.f32 %v573_v10, %v569_v4  ;;  %v692_v39 = vsel %vm691_vm0, %v109_v22, %v671_v26 }
 0x136   : > { %v498_v13 = vld [vmem:[%s2989_s10] sm:$0x1]  ;;  %s627_s28 = scalar_lea.vmem %s2633_s1, %s2431_s22  ;;  %s2499_s16 = sld [smem:[#allocation4 + %s645_s25]]  ;;  %v269_v18 = vadd.f32 %v268_v8, %v264_v2 }
 0x137   : > { %v623_v14 = vld [vmem:[%s622_s11] sm:$0x1]  ;;  %s632_s14 = scalar_lea.vmem %s2633_s1, %s2442_s8  ;;  %s2510_s11 = sld [smem:[#allocation4 + %s650_s3]]  ;;  %v499_v23 = vadd.f32 %v498_v13, %v494_v9 }
 0x138   : > { %s2990_s23 = scalar_lea.vmem %s2633_s1, %s2985_s17  ;;  %s2991_s20 = sld [smem:[#allocation70_spill]]  ;;  %v628_v21 = vld [vmem:[%s627_s28] sm:$0x1]  ;;  %v624_v25 = vadd.f32 %v623_v14, %v619_v17  ;;  %v674_v35 = vrot.slane %v269_v18, 6 }
 0x139   : > { %v423_v16 = vld [vmem:[%s2990_s23] sm:$0x1]  ;;  %s655_s17 = sadd.s32 13, %s2253_s0  ;;  %s2993_s21 = sld [smem:[#allocation85_spill]] }
 0x13a   : > { %s2992_s12 = scalar_lea.vmem %s2633_s1, %s2988_s13  ;;  %s660_s19 = sadd.s32 14, %s2253_s0  ;;  %v424_v27 = vadd.f32 %v423_v16, %v419_v12  ;;  %v633_v29 = vld [vmem:[%s632_s14] sm:$0x1]  ;;  %v629_v32 = vadd.f32 %v628_v21, %v624_v25  ;;  %v694_v47 = vsel %vm693_vm1, %v692_v39, %v674_v35 }
 0x13b   : > { %v348_v19 = vld [vmem:[%s2992_s12] sm:$0x1]  ;;  %s2994_s3 = scalar_lea.vmem %s2633_s1, %s2241_s24  ;;  %s637_s13 = scalar_lea.vmem %s2633_s1, %s2460_s30 }
 0x13c   : > { %v578_v24 = vld [vmem:[%s2994_s3] sm:$0x1]  ;;  %s2528_s10 = sld [smem:[#allocation4 + %s655_s17]]  ;;  %s2995_s28 = scalar_lea.vmem %s2633_s1, %s1965_s27  ;;  %v349_v30 = vadd.f32 %v348_v19, %v344_v15  ;;  %v634_v38 = vadd.f32 %v633_v29, %v629_v32 }
 0x13d   : > { %v503_v28 = vld [vmem:[%s2995_s28] sm:$0x1]  ;;  %s642_s29 = scalar_lea.vmem %s2633_s1, %s2476_s4  ;;  %s2997_s12 = sld [smem:[#allocation27_spill]]  ;;  %v579_v33 = vadd.f32 %v578_v24, %v574_v20 }
 0x13e   : > { %s582_s24 = scalar_lea.vmem %s2633_s1, %s2991_s20  ;;  %s2998_s27 = sld [smem:[#allocation71_spill]]  ;;  %v638_v34 = vld [vmem:[%s637_s13] sm:$0x1]  ;;  %v504_v36 = vadd.f32 %v503_v28, %v499_v23  ;;  %v677_v44 = vrot.slane %v349_v30, 5 }
 0x13f   : > { %s2996_s18 = scalar_lea.vmem %s2633_s1, %s2993_s21  ;;  %s2548_s17 = sld [smem:[#allocation4 + %s660_s19]]  ;;  %v583_v37 = vld [vmem:[%s582_s24] sm:$0x1]  ;;  %v639_v43 = vadd.f32 %v638_v34, %v634_v38 }
 0x140   : > { %v428_v31 = vld [vmem:[%s2996_s18] sm:$0x1]  ;;  %s665_s25 = sadd.s32 15, %s2253_s0  ;;  %s647_s20 = scalar_lea.vmem %s2633_s1, %s2499_s16  ;;  %v584_v45 = vadd.f32 %v583_v37, %v579_v33  ;;  %v696_v54 = vsel %vm695_vm2, %v694_v47, %v677_v44 }
 0x141   : > { %s2555_s8 = sld [smem:[#allocation4 + %s665_s25]]  ;;  %v429_v40 = vadd.f32 %v428_v31, %v424_v27  ;;  %v643_v42 = vld [vmem:[%s642_s29] sm:$0x1]  ;;  %s652_s15 = scalar_lea.vmem %s2633_s1, %s2510_s11 }
 0x142   : > { %v648_v46 = vld [vmem:[%s647_s20] sm:$0x1]  ;;  %v644_v50 = vadd.f32 %v643_v42, %v639_v43  ;;  %s657_s7 = scalar_lea.vmem %s2633_s1, %s2528_s10  ;;  %s3000_s23 = sld [smem:[#allocation9_spill]] }
 0x143   : > { %s2999_s0 = scalar_lea.vmem %s2633_s1, %s2997_s12  ;;  %v653_v51 = vld [vmem:[%s652_s15] sm:$0x1]  ;;  %v680_v52 = vrot.slane %v429_v40, 4 }
 0x144   : > { %v508_v41 = vld [vmem:[%s2999_s0] sm:$0x1]  ;;  %s587_s5 = scalar_lea.vmem %s2633_s1, %s2998_s27  ;;  %v649_v53 = vadd.f32 %v648_v46, %v644_v50 }
 0x145   : > { %v509_v48 = vadd.f32 %v508_v41, %v504_v36  ;;  %v588_v49 = vld [vmem:[%s587_s5] sm:$0x1]  ;;  %s662_s11 = scalar_lea.vmem %s2633_s1, %s2548_s17  ;;  %v698_v60 = vsel %vm697_vm3, %v696_v54, %v680_v52 }
 0x146   : > { %v589_v55 = vadd.f32 %v588_v49, %v584_v45  ;;  %v658_v56 = vld [vmem:[%s657_s7] sm:$0x1]  ;;  %v654_v57 = vadd.f32 %v653_v51, %v649_v53 }
 0x147   : > { %s667_s30 = scalar_lea.vmem %s2633_s1, %s2555_s8  ;;  %v683_v58 = vrot.slane %v509_v48, 3  ;;  %v663_v59 = vld [vmem:[%s662_s11] sm:$0x1] }
 0x148   : > { %v659_v61 = vadd.f32 %v658_v56, %v654_v57  ;;  %v668_v62 = vld [vmem:[%s667_s30] sm:$0x1]  ;;  %v686_v63 = vrot.slane %v589_v55, 2  ;;  %s970_s10 = sshll.u32 %s3000_s23, 3  ;;  %s28_s21 = sadd.s32 1, %s3000_s23  }
 0x149   : > { %v700_v1 = vsel %vm699_vm4, %v698_v60, %v683_v58  ;;  %s705_s22 = scalar_lea.vmem [#allocation2], %s970_s10  ;;  %p25_p5 = scmp.ge.s32.totalorder %s28_s21, 3  }
 0x14a   : > { %v664_v0 = vadd.f32 %v663_v59, %v659_v61  ;;  %v702_v3 = vsel %vm701_vm5, %v700_v1, %v686_v63  ;;  %s3001_s27 = sld [smem:[#allocation86_spill]] (%p25_p5)  ;;  %v1123_v9 = vmov (%p25_p5), 0.0|0.0   ;;  %vm1124_vm8 = vmmov (%p25_p5), 0   ;;  %s3002_s6 = sld [smem:[#allocation87_spill]] (%p25_p5) }
 0x14b   :  { %27 = sbr.rel (!%p25_p5) target bundleno = 18 (0x12), region = 168  ;;  %1053 = vmatprep.subr.bf16.mxu1 (%p25_p5), %v1123_v9  ;;  %1041 = vmatprep.subr.bf16.mxu0 (%p25_p5), %v1123_v9  ;;  %v1125_v12 = vmov (%p25_p5), 0.0   ;;  %s1126_s28 = smov (%p25_p5), [#allocation5]  }
 0x14c   : > { %v669_v2 = vadd.f32 %v668_v62, %v664_v0  ;;  %1035 = vmatprep.mubr.msk.f32.mxu1 (%p25_p5), %vm1124_vm8, %v1125_v12  ;;  %1032 = vmatprep.mubr.msk.f32.mxu0 (%p25_p5), %vm1124_vm8, %v1125_v12  ;;  %s824_s7 = sshll.u32 (%p25_p5), %s1126_s28, 4  ;;  %s825_s7 = int_to_ptr.vmem [resolvable:$true] %s824_s7 }
 0x14d   :  { %s1088_s9 = scalar_lea.vmem (%p25_p5), %s825_s7, 384  ;;  %p1093_p7 = scmp.lt.s32.totalorder (%p25_p5), %s825_s7, %s825_s7 }
 0x14e   : > { %v689_v4 = vrot.slane %v669_v2, 1  ;;  %p1089_p6 = scmp.ne.s32.totalorder (%p25_p5), %s825_s7, %s1088_s9  ;;  %p1094_p8 = scmp.lt.s32.totalorder (%p25_p5), %s1088_s9, %s1088_s9 }
 0x150   : > { %v704_v5 = vsel %vm703_vm6, %v702_v3, %v689_v4  ;;  %v711_v6 = vld [vmem:[%s3001_s27] sm:$0xff] (%p25_p5)  ;;  %v712_v7 = vld [vmem:[%s3001_s27 + $0x8] sm:$0xff] (%p25_p5)  ;;  %v713_v8 = vld [vmem:[%s3001_s27 + $0x10] sm:$0xff] (%p25_p5)  ;;  %p1095_p9 = por (%p25_p5), %p1094_p8, %p1093_p7 }
 0x151   : > { %707 = vst.msk [vmem:[%s705_s22] sm:$0xff] %vm706_vm7, %v704_v5  ;;  %v1042_v10 = vpack.c.bf16 (%p25_p5), %v712_v7, %v711_v6  ;;  %v714_v11 = vld [vmem:[%s3001_s27 + $0x18] sm:$0xff] (%p25_p5)  ;;  %v715_v14 = vld [vmem:[%s3001_s27 + $0x20] sm:$0xff] (%p25_p5)  ;;  %v716_v15 = vld [vmem:[%s3001_s27 + $0x28] sm:$0xff] (%p25_p5) }
 0x152   :  { %v1045_v13 = vpack.c.bf16 %v714_v11, %v713_v8  ;;  %v1048_v16 = vpack.c.bf16 %v716_v15, %v715_v14  ;;  %v717_v17 = vld [vmem:[%s3001_s27 + $0x30] sm:$0xff]  ;;  %v718_v18 = vld [vmem:[%s3001_s27 + $0x38] sm:$0xff]  ;;  %v979_v23 = vld [vmem:[%s3002_s6] ss:$0 sm:$0xff]  ;;  %p1096_p10 = pnand %p1095_p9, %p1089_p6 }
 0x153   :  { %1057 = vmatpush3.bf16.msra.mxu1 %v1042_v10  ;;  %1043 = vmatpush3.bf16.msra.mxu0 %v1042_v10  ;;  %v1051_v19 = vpack.c.bf16 %v718_v18, %v717_v17 }
 0x154   :  { %1054 = vmatprep.subr.bf16.mxu1 %v1123_v9  ;;  %1044 = vmatprep.subr.bf16.mxu0 %v1123_v9 }
 0x157   :  { %1058 = vmatpush3.bf16.msra.mxu1 %v1045_v13  ;;  %1046 = vmatpush3.bf16.msra.mxu0 %v1045_v13 }
 0x158   :  { %1055 = vmatprep.subr.bf16.mxu1 %v1123_v9  ;;  %1047 = vmatprep.subr.bf16.mxu0 %v1123_v9  ;;  %v709_v20 = vld [vmem:[#allocation2 + $0x8] sm:$0xff]  ;;  %v708_v21 = vld [vmem:[#allocation2] sm:$0xff]  ;;  %v710_v22 = vld [vmem:[#allocation2 + $0x10] sm:$0xff] }
 0x15b   :  { %1059 = vmatpush3.bf16.msra.mxu1 %v1048_v16  ;;  %1049 = vmatpush3.bf16.msra.mxu0 %v1048_v16 }
 0x15c   :  { %1056 = vmatprep.subr.bf16.mxu1 %v1123_v9  ;;  %1050 = vmatprep.subr.bf16.mxu0 %v1123_v9 }
 0x15f   :  { %1060 = vmatpush3.bf16.msra.mxu1 %v1051_v19  ;;  %1052 = vmatpush3.bf16.msra.mxu0 %v1051_v19 }
 0x162   :  { %1036 = vmatmul.mubr.msk.f32.vlgmr.msra.gmra.mrb[0].mxu1 %vm706_vm7, %v709_v20  ;;  %1033 = vmatmul.mubr.msk.f32.vlgmr.msra.gmra.mrb[0].mxu0 %vm706_vm7, %v708_v21 }
 0x163   :  { %1038 = vmatprep.mubr.msk.f32.mxu1 %vm1124_vm8, %v1125_v12 }
 0x166   :  { %1039 = vmatmul.mubr.msk.f32.gmra.mrb[2].mxu1 %vm706_vm7, %v710_v22 }
 0x235   :  { %v807_v24 = vpop.f32.mrb[0].mxu1  ;;  %v802_v25 = vpop.f32.mrb[0].mxu0 }
 0x236   :  { %v808_v26 = vadd.f32 %v979_v23, %v807_v24  ;;  %v1037_v27 = vpop.f32.mrb[1].mxu1  ;;  %v803_v28 = vadd.f32 %v979_v23, %v802_v25  ;;  %v1034_v29 = vpop.f32.mrb[1].mxu0 }
 0x238   :  { %817 = vst [vmem:[#allocation5 + $0x8] sm:$0xff] %v808_v26  ;;  %816 = vst [vmem:[#allocation5] sm:$0xff] %v803_v28 }
 0x239   :  { %v812_v30 = vpop.f32.mrb[2].mxu1 }
 0x23a   :  { %v813_v31 = vadd.f32 %v979_v23, %v812_v30  ;;  %v1040_v32 = vpop.f32.mrb[3].mxu1 }
 0x23c   :  { %818 = vst [vmem:[#allocation5 + $0x10] sm:$0xff] %v813_v31 }
 0x23d   :  { %1099 = shalt.err (!%p1096_p10)
}
 0x23e   :  { %s3003_s23 = sld [smem:[#allocation88_spill]] }
 0x244   :  { %s1100_s26 = scalar_lea.hbm %s3003_s23, 384 }
 0x245   :  { %p1101_p11 = scmp.ne.s32.totalorder %s3003_s23, %s1100_s26  ;;  %p1104_p12 = scmp.lt.u32.totalorder %s1100_s26, %s3003_s23 }
 0x247   :  { %p1106_p13 = pnand %p1104_p12, %p1101_p11 }
 0x249   :  { %1109 = shalt.err (!%p1106_p13)
}
 0x24a   :  { %s1127_s18 = smov 128   ;;  %s1128_s12 = smov 8  }
 0x24b   :  { %830 = dma.vmem_to_hbm [thread:$0]  %s825_s7, 384, %s3003_s23, [#allocation6], %s1127_s18, %s1127_s18, %s1128_s12  }
 0x24c   :  { %1116 = dma.done.wait [#allocation6], 384  }
 0x24d   :  { %1117 = vsyncadd [#allocation6], 4294966912 }
 0x24e   :  { %834 = vsyncpa [#allocation6], 1 }

</bundles_post_ra>
